<compile_context>
chip_gen: v5e
topology: v5e:2x2
jax: 0.10.0
libtpu: 0.0.40
codegen_flags: <defaults>
</compile_context>

<pallas_src>
import functools

import numpy as np
import jax
import jax.numpy as jnp
from jax import lax
from jax.experimental import pallas as pl
from jax.experimental.pallas import tpu as pltpu

_LN_EPS = 1e-5
_SQRT2_INV = 0.7071067811865476


def _erf(x):
    # Abramowitz & Stegun 7.1.26 rational approximation (|err| < 1.5e-7).
    # The divide is an EUP approximate reciprocal (off the VPU critical chain).
    a1, a2, a3, a4, a5 = (0.254829592, -0.284496736, 1.421413741,
                          -1.453152027, 1.061405429)
    p = 0.3275911
    ax = jnp.abs(x)
    t = pl.reciprocal(1.0 + p * ax, approx=True)
    poly = ((((a5 * t + a4) * t + a3) * t + a2) * t + a1) * t
    y = 1.0 - poly * jnp.exp(-ax * ax)
    return jnp.where(x < 0.0, -y, y)


def _gelu(x):
    return 0.5 * x * (1.0 + _erf(x * _SQRT2_INV))


def _layernorm(x, gamma, beta):
    # Single-pass LN: mean and mean-of-squares are independent reductions, so
    # the two XLU cross-lane reduces can issue back-to-back.
    mu = jnp.mean(x, axis=-1, keepdims=True)
    ms = jnp.mean(x * x, axis=-1, keepdims=True)
    var = jnp.maximum(ms - mu * mu, 0.0)
    return (x - mu) * lax.rsqrt(var + _LN_EPS) * gamma + beta


def _rom_kernel(T, Bp, unroll,
                bc_ref, a0_ref, phiT_ref, coef_ref,
                wa0_ref, w1_ref, w2_ref, w3_ref,
                vk_ref, vd_ref, out_ref, a_seq_ref):
    f32 = jnp.float32

    # ---- hoisted, time-invariant loads (once per kernel invocation) ----
    phiT = phiT_ref[...]                       # (K, nx)
    coef = coef_ref[...]                       # (1, nx)
    wa0 = wa0_ref[...]                         # (K, K)   a0_w^T
    w1 = w1_ref[...]                           # (K, D)   f1_w^T
    w2 = w2_ref[...]                           # (D, D)   f2_w^T
    w3 = w3_ref[...]                           # (D, K)   f3_w^T
    b1, b2 = vd_ref[0:1, :], vd_ref[1:2, :]
    a0_b, a0_g, a0_bt = vk_ref[0:1, :], vk_ref[1:2, :], vk_ref[2:3, :]
    b3, f_g, f_bt = vk_ref[3:4, :], vk_ref[4:5, :], vk_ref[5:6, :]
    c_a, c_f, c_c = vk_ref[6:7, :], vk_ref[7:8, :], vk_ref[8:9, :]

    # ---- a0 mapping: Linear -> ReLU -> LayerNorm (applied once) ----
    a = jnp.dot(a0_ref[...], wa0, preferred_element_type=f32) + a0_b   # (Bp, K)
    a = _layernorm(jnp.maximum(a, 0.0), a0_g, a0_bt)

    # ---- serial recurrence: ONLY the per-step dependent work lives here ----
    def step(t, a):
        # ImprovedUpdateFFN (dropout == identity at inference).
        h1 = _gelu(jnp.dot(a, w1, preferred_element_type=f32) + b1)    # (Bp, D)
        h2 = _gelu(jnp.dot(h1, w2, preferred_element_type=f32) + b2)   # (Bp, D)
        mlp = jnp.dot(h2, w3, preferred_element_type=f32) + b3         # (Bp, K)
        ffn = _layernorm(mlp + a, f_g, f_bt)                           # (Bp, K)

        # Folded linear-attention update (exact reassociation — see wrapper):
        #   a_next = a + attn + ffn = c_a * a + c_f * ffn + c_c
        a_next = c_a * a + c_f * ffn + c_c                             # (Bp, K)

        # Tile-aligned dynamic row store (Bp % 8 == 0) into the a-history.
        row = pl.multiple_of(t * Bp, Bp)
        a_seq_ref[pl.ds(row, Bp), :] = a_next
        return a_next

    lax.fori_loop(0, T, step, a, unroll=unroll)

    # ---- hoisted non-recurrent tail: ONE big MXU matmul + bulk store ----
    a_all = a_seq_ref[...]                                             # (T*Bp, K)
    recon = jnp.dot(a_all, phiT, preferred_element_type=f32)           # (T*Bp, nx)
    bc = bc_ref[...]                                                   # (T*Bp, C)
    u_b = bc[:, 0:1] * (1.0 - coef) + bc[:, 1:2] * coef                # (T*Bp, nx)
    out_ref[...] = u_b + recon


def _padded_vmem_bytes(shape, itemsize=4):
    """Bytes one f32 buffer occupies in VMEM with (8,128) tile padding."""
    if len(shape) == 1:
        r, c = 1, shape[0]
    else:
        r, c = int(np.prod(shape[:-1])), shape[-1]
    return (-(-r // 8) * 8) * (-(-c // 128) * 128) * itemsize


def multivar_attention_rom_forward(params, a0_dict, bc_ctrl_seq, T, *, num_heads):
    """Pallas forward pass of MultiVarAttentionROM (fixed lifting, 1 state var)."""
    (skey,) = list(a0_dict.keys())     # TODO(synk): single state variable only
    p = params[skey]
    f32 = jnp.float32
    hp = lax.Precision.HIGHEST

    phi = jnp.asarray(p["Phi"], f32)                 # (nx, K)
    nx, K = phi.shape
    wq = jnp.asarray(p["Wq"], f32)                   # (D, 1)
    D = wq.shape[0]
    assert D % num_heads == 0, "d_model must be divisible by num_heads"
    hd = D // num_heads

    a0 = jnp.asarray(a0_dict[skey], f32)             # (B, K)
    B = a0.shape[0]
    C = bc_ctrl_seq.shape[2]
    assert bc_ctrl_seq.shape == (B, T, C) and C >= 2

    # ---- pad batch to a sublane multiple (free compute-wise; store alignment) ----
    Bp = ((B + 7) // 8) * 8
    a0p = jnp.pad(a0, ((0, Bp - B), (0, 0))) if Bp != B else a0
    bcp = jnp.asarray(bc_ctrl_seq, f32)
    if Bp != B:
        bcp = jnp.pad(bcp, ((0, Bp - B), (0, 0), (0, 0)))
    bc2 = jnp.transpose(bcp, (1, 0, 2)).reshape(T * Bp, C)             # (T*Bp, C)

    # ---- time-invariant K/V path, hoisted out of the time loop ----
    phiT = phi.T                                                            # (K, nx)
    Km = jnp.matmul(phiT, jnp.asarray(p["Wk"], f32).T, precision=hp) \
        + jnp.asarray(p["bk"], f32)                                         # (K, D)
    Vm = jnp.matmul(phiT, jnp.asarray(p["Wv"], f32).T, precision=hp) \
        + jnp.asarray(p["bv"], f32)                                         # (K, D)
    Kh = Km.reshape(K, num_heads, hd).transpose(1, 0, 2)                    # (H, K, hd)
    Vh = Vm.reshape(K, num_heads, hd).transpose(1, 0, 2)
    KVh = jnp.einsum("hkd,hke->hde", Kh, Vh, precision=hp)                  # (H, hd, hd)

    # ---- algebraic fold of the attention output chain (Wproj: D -> 1) ----
    #   attn[b,i] = (Q[b,i,:] @ v + bout @ Wproj^T) / sqrt(D) + bproj
    #   Q[b,i,:]  = a[b,i]*Wq[:,0] + bq + alpha*ffn[b,i]
    #   => a_next = (1 + Wq[:,0].v/sqrt(D)) * a
    #             + (1 + alpha*sum(v)/sqrt(D)) * ffn
    #             + (bq.v + bout.Wproj_row)/sqrt(D) + bproj
    w_op = jnp.matmul(jnp.asarray(p["Wout"], f32).T,
                      jnp.asarray(p["Wproj"], f32).T, precision=hp)         # (D, 1)
    v = jnp.einsum("hde,he->hd", KVh, w_op.reshape(num_heads, hd),
                   precision=hp).reshape(D)
    inv_sqrt_d = 1.0 / np.sqrt(float(D))
    alpha = jnp.asarray(p["alpha"], f32)
    bq = jnp.asarray(p["bq"], f32)
    bout = jnp.asarray(p["bout"], f32)
    wproj_row = jnp.asarray(p["Wproj"], f32)[0]
    bproj = jnp.asarray(p["bproj"], f32).reshape(())
    c_a = 1.0 + jnp.dot(wq[:, 0], v, precision=hp) * inv_sqrt_d
    c_f = 1.0 + alpha * jnp.sum(v) * inv_sqrt_d
    c_c = (jnp.dot(bq, v, precision=hp)
           + jnp.dot(bout, wproj_row, precision=hp)) * inv_sqrt_d + bproj

    # ---- pack tiny per-feature constants into two VMEM arrays ----
    vk = jnp.stack([
        jnp.asarray(p["a0_b"], f32), jnp.asarray(p["a0_g"], f32),
        jnp.asarray(p["a0_beta"], f32),
        jnp.asarray(p["f3_b"], f32), jnp.asarray(p["f_g"], f32),
        jnp.asarray(p["f_beta"], f32),
        jnp.broadcast_to(c_a.astype(f32), (K,)),
        jnp.broadcast_to(c_f.astype(f32), (K,)),
        jnp.broadcast_to(c_c.astype(f32), (K,)),
    ], axis=0)                                                              # (9, K)
    vd = jnp.stack([jnp.asarray(p["f1_b"], f32),
                    jnp.asarray(p["f2_b"], f32)], axis=0)                   # (2, D)

    coef = jnp.linspace(0.0, 1.0, nx, dtype=f32).reshape(1, nx)
    wa0T = jnp.asarray(p["a0_w"], f32).T
    w1T = jnp.asarray(p["f1_w"], f32).T
    w2T = jnp.asarray(p["f2_w"], f32).T
    w3T = jnp.asarray(p["f3_w"], f32).T

    unroll = True if T <= 32 else 16

    # ---- VMEM sizing (item: explicit vmem_limit_bytes) and cost estimate ----
    buf_shapes = [bc2.shape, a0p.shape, phiT.shape, coef.shape, wa0T.shape,
                  w1T.shape, w2T.shape, w3T.shape, vk.shape, vd.shape,
                  (T * Bp, nx), (T * Bp, K)]
    total_vmem = sum(_padded_vmem_bytes(s) for s in buf_shapes)
    vmem_limit = int(min(64 * 2**20, max(32 * 2**20, 2 * total_vmem + (1 << 20))))

    flops = int(T * 2 * Bp * (K * D + D * D + D * K)          # per-step FFN
                + 2 * T * Bp * K * nx                          # bulk reconstruction
                + 2 * Bp * K * K)                              # a0 mapping
    transcendentals = int(T * Bp * (2 * D + K) + Bp * K)
    bytes_accessed = int(4 * (bc2.size + a0p.size + phiT.size + coef.size
                              + wa0T.size + w1T.size + w2T.size + w3T.size
                              + vk.size + vd.size + T * Bp * nx))

    vmem_spec = pl.BlockSpec(memory_space=pltpu.MemorySpace.VMEM)
    out = pl.pallas_call(
        functools.partial(_rom_kernel, T, Bp, unroll),
        out_shape=jax.ShapeDtypeStruct((T * Bp, nx), f32),
        in_specs=[vmem_spec] * 10,
        out_specs=vmem_spec,
        scratch_shapes=[pltpu.VMEM((T * Bp, K), jnp.float32)],
        compiler_params=pltpu.CompilerParams(vmem_limit_bytes=vmem_limit),
        cost_estimate=pl.CostEstimate(flops=flops,
                                      transcendentals=transcendentals,
                                      bytes_accessed=bytes_accessed),
    )(bc2, a0p, phiT, coef, wa0T, w1T, w2T, w3T, vk, vd)

    # (T*Bp, nx) -> (T, B, nx, 1); the reshape is a free bitcast, the batch
    # slice drops the sublane padding.
    u = out.reshape(T, Bp, nx)[:, :B, :]
    return {skey: u[..., None]}, None                # (U_hat_seq_dict, err_seq)


def init_params(key, state_keys, nx, basis_dim, d_model, initial_alpha=0.1):
    """Deterministic parameter init mirroring the torch module's shapes."""
    def linear(k, out_dim, in_dim):
        kw, kb = jax.random.split(k)
        s = 1.0 / np.sqrt(in_dim)
        w = jax.random.uniform(kw, (out_dim, in_dim), jnp.float32, -s, s)
        b = jax.random.uniform(kb, (out_dim,), jnp.float32, -s, s)
        return w, b

    params = {}
    for i, skey in enumerate(state_keys):
        k = jax.random.fold_in(key, i)
        ks = jax.random.split(k, 10)
        phi = jax.nn.initializers.orthogonal()(ks[0], (nx, basis_dim), jnp.float32)
        a0_w, a0_b = linear(ks[1], basis_dim, basis_dim)
        Wq, bq = linear(ks[2], d_model, 1)
        Wk, bk = linear(ks[3], d_model, nx)
        Wv, bv = linear(ks[4], d_model, nx)
        f1_w, f1_b = linear(ks[5], d_model, basis_dim)
        f2_w, f2_b = linear(ks[6], d_model, d_model)
        f3_w, f3_b = linear(ks[7], basis_dim, d_model)
        Wout, bout = linear(ks[8], d_model, d_model)
        Wproj, bproj = linear(ks[9], 1, d_model)
        params[skey] = dict(
            Phi=phi,
            a0_w=a0_w, a0_b=a0_b,
            a0_g=jnp.ones((basis_dim,), jnp.float32),
            a0_beta=jnp.zeros((basis_dim,), jnp.float32),
            Wq=Wq, bq=bq, Wk=Wk, bk=bk, Wv=Wv, bv=bv,
            f1_w=f1_w, f1_b=f1_b, f2_w=f2_w, f2_b=f2_b, f3_w=f3_w, f3_b=f3_b,
            f_g=jnp.ones((basis_dim,), jnp.float32),
            f_beta=jnp.zeros((basis_dim,), jnp.float32),
            Wout=Wout, bout=bout, Wproj=Wproj, bproj=bproj,
            alpha=jnp.asarray(initial_alpha, jnp.float32),
        )
    return params


def reference_forward(params, a0_dict, bc_ctrl_seq, T, *, num_heads):
    """Pure-JAX mirror of the PyTorch forward (batch-major), for validation."""
    hp = lax.Precision.HIGHEST
    (skey,) = list(a0_dict.keys())
    p = params[skey]
    a0 = a0_dict[skey]
    nx, basis_dim = p["Phi"].shape
    d_model = p["Wq"].shape[0]
    head_dim = d_model // num_heads
    B = a0.shape[0]

    def gelu(x):
        return 0.5 * x * (1.0 + jax.scipy.special.erf(x / np.sqrt(2.0)))

    def ln(x, g, b):
        mu = x.mean(-1, keepdims=True)
        var = ((x - mu) ** 2).mean(-1, keepdims=True)
        return (x - mu) / jnp.sqrt(var + _LN_EPS) * g + b

    a = jnp.maximum(jnp.matmul(a0, p["a0_w"].T, precision=hp) + p["a0_b"], 0.0)
    a = ln(a, p["a0_g"], p["a0_beta"])
    coeffs = jnp.linspace(0.0, 1.0, nx, dtype=jnp.float32)

    PhiT = p["Phi"].T
    Km = jnp.matmul(PhiT, p["Wk"].T, precision=hp) + p["bk"]            # (K, D)
    Vm = jnp.matmul(PhiT, p["Wv"].T, precision=hp) + p["bv"]            # (K, D)
    Kh = Km.reshape(basis_dim, num_heads, head_dim).transpose(1, 0, 2)
    Vh = Vm.reshape(basis_dim, num_heads, head_dim).transpose(1, 0, 2)
    KV = jnp.einsum("hkd,hke->hde", Kh, Vh, precision=hp)

    outs = []
    for t in range(T):
        bc = bc_ctrl_seq[:, t, :]
        h = gelu(jnp.matmul(a, p["f1_w"].T, precision=hp) + p["f1_b"])
        h = gelu(jnp.matmul(h, p["f2_w"].T, precision=hp) + p["f2_b"])
        mlp = jnp.matmul(h, p["f3_w"].T, precision=hp) + p["f3_b"]
        ffn_u = ln(mlp + a, p["f_g"], p["f_beta"])
        Q = (a[:, :, None] * p["Wq"][:, 0][None, None, :] + p["bq"][None, None, :]
             + p["alpha"] * ffn_u[:, :, None])                          # (B, K, D)
        Qh = Q.reshape(B, basis_dim, num_heads, head_dim).transpose(0, 2, 1, 3)
        zh = jnp.einsum("bhkd,hde->bhke", Qh, KV, precision=hp)
        z = zh.transpose(0, 2, 1, 3).reshape(B, basis_dim, d_model)
        z = jnp.matmul(z, p["Wout"].T, precision=hp) + p["bout"]
        z = z / np.sqrt(float(d_model))
        a_attn = (jnp.matmul(z, p["Wproj"].T, precision=hp) + p["bproj"])[..., 0]
        a = a + a_attn + ffn_u
        U_B = bc[:, 0:1] * (1.0 - coeffs)[None, :] + bc[:, 1:2] * coeffs[None, :]
        U_rec = jnp.matmul(a, p["Phi"].T, precision=hp)
        outs.append((U_B + U_rec)[..., None])
    return {skey: jnp.stack(outs, axis=0)}, None


if __name__ == "__main__":
    B, T = 2, 6
    nx, basis_dim, d_model, num_heads, bc_state_dim = 16, 8, 32, 4, 2
    state_keys = ["U"]

    root = jax.random.PRNGKey(0)
    k_par, k_a0, k_bc = jax.random.split(root, 3)
    params = init_params(k_par, state_keys, nx, basis_dim, d_model)
    a0_dict = {"U": jax.random.normal(k_a0, (B, basis_dim), jnp.float32)}
    bc_ctrl_seq = jax.random.normal(k_bc, (B, T, bc_state_dim), jnp.float32)

    u_hat_seq, err_seq = multivar_attention_rom_forward(
        params, a0_dict, bc_ctrl_seq, T, num_heads=num_heads)
    u = jax.block_until_ready(u_hat_seq["U"])

    u_ref, _ = reference_forward(params, a0_dict, bc_ctrl_seq, T, num_heads=num_heads)
    max_err = float(jnp.max(jnp.abs(u - u_ref["U"])))
    assert u.shape == (T, B, nx, 1), u.shape
    assert max_err < 1e-2, f"max abs err {max_err}"
    print("KERNEL_OK")
</pallas_src>

<mosaic_0001>
module attributes {stable_mosaic.version = 11 : i64} {
  func.func @_rom_kernel(%arg0: memref<48x2xf32, #tpu.memory_space<vmem>>, %arg1: memref<8x8xf32, #tpu.memory_space<vmem>>, %arg2: memref<8x16xf32, #tpu.memory_space<vmem>>, %arg3: memref<1x16xf32, #tpu.memory_space<vmem>>, %arg4: memref<8x8xf32, #tpu.memory_space<vmem>>, %arg5: memref<8x32xf32, #tpu.memory_space<vmem>>, %arg6: memref<32x32xf32, #tpu.memory_space<vmem>>, %arg7: memref<32x8xf32, #tpu.memory_space<vmem>>, %arg8: memref<9x8xf32, #tpu.memory_space<vmem>>, %arg9: memref<2x32xf32, #tpu.memory_space<vmem>>, %arg10: memref<48x16xf32, #tpu.memory_space<vmem>>, %arg11: memref<48x8xf32, #tpu.memory_space<vmem>>) attributes {dimension_semantics = [], scalar_prefetch = 0 : i64, scratch_operands = 1 : i64, tpu.core_type = #tpu.core_type<tc>} {
    %c0 = arith.constant 0 : index
    %c0_0 = arith.constant 0 : index
    %0 = vector.load %arg2[%c0, %c0_0] : memref<8x16xf32, #tpu.memory_space<vmem>>, vector<8x16xf32>
    %c0_1 = arith.constant 0 : index
    %c0_2 = arith.constant 0 : index
    %1 = vector.load %arg3[%c0_1, %c0_2] : memref<1x16xf32, #tpu.memory_space<vmem>>, vector<1x16xf32>
    %c0_3 = arith.constant 0 : index
    %c0_4 = arith.constant 0 : index
    %2 = vector.load %arg4[%c0_3, %c0_4] : memref<8x8xf32, #tpu.memory_space<vmem>>, vector<8x8xf32>
    %c0_5 = arith.constant 0 : index
    %c0_6 = arith.constant 0 : index
    %3 = vector.load %arg5[%c0_5, %c0_6] : memref<8x32xf32, #tpu.memory_space<vmem>>, vector<8x32xf32>
    %c0_7 = arith.constant 0 : index
    %c0_8 = arith.constant 0 : index
    %4 = vector.load %arg6[%c0_7, %c0_8] : memref<32x32xf32, #tpu.memory_space<vmem>>, vector<32x32xf32>
    %c0_9 = arith.constant 0 : index
    %c0_10 = arith.constant 0 : index
    %5 = vector.load %arg7[%c0_9, %c0_10] : memref<32x8xf32, #tpu.memory_space<vmem>>, vector<32x8xf32>
    %c0_11 = arith.constant 0 : index
    %c0_12 = arith.constant 0 : index
    %6 = vector.load %arg9[%c0_11, %c0_12] : memref<2x32xf32, #tpu.memory_space<vmem>>, vector<1x32xf32>
    %c1 = arith.constant 1 : index
    %c0_13 = arith.constant 0 : index
    %7 = vector.load %arg9[%c1, %c0_13] : memref<2x32xf32, #tpu.memory_space<vmem>>, vector<1x32xf32>
    %c0_14 = arith.constant 0 : index
    %c0_15 = arith.constant 0 : index
    %8 = vector.load %arg8[%c0_14, %c0_15] : memref<9x8xf32, #tpu.memory_space<vmem>>, vector<1x8xf32>
    %c1_16 = arith.constant 1 : index
    %c0_17 = arith.constant 0 : index
    %9 = vector.load %arg8[%c1_16, %c0_17] : memref<9x8xf32, #tpu.memory_space<vmem>>, vector<1x8xf32>
    %c2 = arith.constant 2 : index
    %c0_18 = arith.constant 0 : index
    %10 = vector.load %arg8[%c2, %c0_18] : memref<9x8xf32, #tpu.memory_space<vmem>>, vector<1x8xf32>
    %c3 = arith.constant 3 : index
    %c0_19 = arith.constant 0 : index
    %11 = vector.load %arg8[%c3, %c0_19] : memref<9x8xf32, #tpu.memory_space<vmem>>, vector<1x8xf32>
    %c4 = arith.constant 4 : index
    %c0_20 = arith.constant 0 : index
    %12 = vector.load %arg8[%c4, %c0_20] : memref<9x8xf32, #tpu.memory_space<vmem>>, vector<1x8xf32>
    %c5 = arith.constant 5 : index
    %c0_21 = arith.constant 0 : index
    %13 = vector.load %arg8[%c5, %c0_21] : memref<9x8xf32, #tpu.memory_space<vmem>>, vector<1x8xf32>
    %c6 = arith.constant 6 : index
    %c0_22 = arith.constant 0 : index
    %14 = vector.load %arg8[%c6, %c0_22] : memref<9x8xf32, #tpu.memory_space<vmem>>, vector<1x8xf32>
    %c7 = arith.constant 7 : index
    %c0_23 = arith.constant 0 : index
    %15 = vector.load %arg8[%c7, %c0_23] : memref<9x8xf32, #tpu.memory_space<vmem>>, vector<1x8xf32>
    %c8 = arith.constant 8 : index
    %c0_24 = arith.constant 0 : index
    %16 = vector.load %arg8[%c8, %c0_24] : memref<9x8xf32, #tpu.memory_space<vmem>>, vector<1x8xf32>
    %c0_25 = arith.constant 0 : index
    %c0_26 = arith.constant 0 : index
    %17 = vector.load %arg1[%c0_25, %c0_26] : memref<8x8xf32, #tpu.memory_space<vmem>>, vector<8x8xf32>
    %cst = arith.constant dense<0.000000e+00> : vector<8x8xf32>
    %18 = tpu.matmul %17, %2, %cst {dimension_numbers = #tpu.dot_dimension_numbers<[1], [0], [0], [1], [0, 0, 1, 1], [], []>} : vector<8x8xf32>, vector<8x8xf32>, vector<8x8xf32> -> vector<8x8xf32>
    %19 = vector.broadcast %8 : vector<1x8xf32> to vector<8x8xf32>
    %20 = arith.addf %18, %19 : vector<8x8xf32>
    %cst_27 = arith.constant 0.000000e+00 : f32
    %21 = vector.broadcast %cst_27 : f32 to vector<8x8xf32>
    %22 = arith.maximumf %20, %21 : vector<8x8xf32>
    %cst_28 = arith.constant dense<0.000000e+00> : vector<8xf32>
    %23 = vector.multi_reduction <add>, %22, %cst_28 [1] : vector<8x8xf32> to vector<8xf32>
    %24 = vector.shape_cast %23 : vector<8xf32> to vector<8x1xf32>
    %cst_29 = arith.constant 8.000000e+00 : f32
    %25 = vector.broadcast %cst_29 : f32 to vector<8x1xf32>
    %26 = arith.divf %24, %25 : vector<8x1xf32>
    %27 = arith.mulf %22, %22 : vector<8x8xf32>
    %cst_30 = arith.constant dense<0.000000e+00> : vector<8xf32>
    %28 = vector.multi_reduction <add>, %27, %cst_30 [1] : vector<8x8xf32> to vector<8xf32>
    %29 = vector.shape_cast %28 : vector<8xf32> to vector<8x1xf32>
    %cst_31 = arith.constant 8.000000e+00 : f32
    %30 = vector.broadcast %cst_31 : f32 to vector<8x1xf32>
    %31 = arith.divf %29, %30 : vector<8x1xf32>
    %32 = arith.mulf %26, %26 : vector<8x1xf32>
    %33 = arith.subf %31, %32 : vector<8x1xf32>
    %cst_32 = arith.constant 0.000000e+00 : f32
    %34 = vector.broadcast %cst_32 : f32 to vector<8x1xf32>
    %35 = arith.maximumf %33, %34 : vector<8x1xf32>
    %36 = vector.broadcast %26 : vector<8x1xf32> to vector<8x8xf32>
    %37 = arith.subf %22, %36 : vector<8x8xf32>
    %cst_33 = arith.constant 9.99999974E-6 : f32
    %38 = vector.broadcast %cst_33 : f32 to vector<8x1xf32>
    %39 = arith.addf %35, %38 : vector<8x1xf32>
    %40 = math.rsqrt %39 : vector<8x1xf32>
    %41 = vector.broadcast %40 : vector<8x1xf32> to vector<8x8xf32>
    %42 = arith.mulf %37, %41 : vector<8x8xf32>
    %43 = vector.broadcast %9 : vector<1x8xf32> to vector<8x8xf32>
    %44 = arith.mulf %42, %43 : vector<8x8xf32>
    %45 = vector.broadcast %10 : vector<1x8xf32> to vector<8x8xf32>
    %46 = arith.addf %44, %45 : vector<8x8xf32>
    %c0_i32 = arith.constant 0 : i32
    %cst_34 = arith.constant dense<0.000000e+00> : vector<8x32xf32>
    %47 = tpu.matmul %46, %3, %cst_34 {dimension_numbers = #tpu.dot_dimension_numbers<[1], [0], [0], [1], [0, 0, 1, 1], [], []>} : vector<8x8xf32>, vector<8x32xf32>, vector<8x32xf32> -> vector<8x32xf32>
    %48 = vector.broadcast %6 : vector<1x32xf32> to vector<8x32xf32>
    %49 = arith.addf %47, %48 : vector<8x32xf32>
    %cst_35 = arith.constant 5.000000e-01 : f32
    %50 = vector.broadcast %cst_35 : f32 to vector<8x32xf32>
    %51 = arith.mulf %50, %49 : vector<8x32xf32>
    %cst_36 = arith.constant 0.707106769 : f32
    %52 = vector.broadcast %cst_36 : f32 to vector<8x32xf32>
    %53 = arith.mulf %49, %52 : vector<8x32xf32>
    %54 = math.absf %53 : vector<8x32xf32>
    %cst_37 = arith.constant 0.327591091 : f32
    %55 = vector.broadcast %cst_37 : f32 to vector<8x32xf32>
    %56 = arith.mulf %55, %54 : vector<8x32xf32>
    %cst_38 = arith.constant 1.000000e+00 : f32
    %57 = vector.broadcast %cst_38 : f32 to vector<8x32xf32>
    %58 = arith.addf %57, %56 : vector<8x32xf32>
    %59 = tpu.reciprocal %58 {approx = true} : vector<8x32xf32> -> vector<8x32xf32>
    %cst_39 = arith.constant 1.06140542 : f32
    %60 = vector.broadcast %cst_39 : f32 to vector<8x32xf32>
    %61 = arith.mulf %60, %59 : vector<8x32xf32>
    %cst_40 = arith.constant -1.45315206 : f32
    %62 = vector.broadcast %cst_40 : f32 to vector<8x32xf32>
    %63 = arith.addf %61, %62 : vector<8x32xf32>
    %64 = arith.mulf %63, %59 : vector<8x32xf32>
    %cst_41 = arith.constant 1.42141378 : f32
    %65 = vector.broadcast %cst_41 : f32 to vector<8x32xf32>
    %66 = arith.addf %64, %65 : vector<8x32xf32>
    %67 = arith.mulf %66, %59 : vector<8x32xf32>
    %cst_42 = arith.constant -0.284496725 : f32
    %68 = vector.broadcast %cst_42 : f32 to vector<8x32xf32>
    %69 = arith.addf %67, %68 : vector<8x32xf32>
    %70 = arith.mulf %69, %59 : vector<8x32xf32>
    %cst_43 = arith.constant 0.254829586 : f32
    %71 = vector.broadcast %cst_43 : f32 to vector<8x32xf32>
    %72 = arith.addf %70, %71 : vector<8x32xf32>
    %73 = arith.mulf %72, %59 : vector<8x32xf32>
    %cst_44 = arith.constant 0.000000e+00 : f32
    %74 = vector.broadcast %cst_44 : f32 to vector<8x32xf32>
    %75 = arith.subf %74, %54 : vector<8x32xf32>
    %76 = arith.mulf %75, %54 : vector<8x32xf32>
    %77 = math.exp %76 : vector<8x32xf32>
    %78 = arith.mulf %73, %77 : vector<8x32xf32>
    %cst_45 = arith.constant 1.000000e+00 : f32
    %79 = vector.broadcast %cst_45 : f32 to vector<8x32xf32>
    %80 = arith.subf %79, %78 : vector<8x32xf32>
    %cst_46 = arith.constant 0.000000e+00 : f32
    %81 = vector.broadcast %cst_46 : f32 to vector<8x32xf32>
    %82 = arith.cmpf olt, %53, %81 : vector<8x32xf32>
    %cst_47 = arith.constant 0.000000e+00 : f32
    %83 = vector.broadcast %cst_47 : f32 to vector<8x32xf32>
    %84 = arith.subf %83, %80 : vector<8x32xf32>
    %85 = arith.select %82, %84, %80 : vector<8x32xi1>, vector<8x32xf32>
    %cst_48 = arith.constant 1.000000e+00 : f32
    %86 = vector.broadcast %cst_48 : f32 to vector<8x32xf32>
    %87 = arith.addf %86, %85 : vector<8x32xf32>
    %88 = arith.mulf %51, %87 : vector<8x32xf32>
    %cst_49 = arith.constant dense<0.000000e+00> : vector<8x32xf32>
    %89 = tpu.matmul %88, %4, %cst_49 {dimension_numbers = #tpu.dot_dimension_numbers<[1], [0], [0], [1], [0, 0, 1, 1], [], []>} : vector<8x32xf32>, vector<32x32xf32>, vector<8x32xf32> -> vector<8x32xf32>
    %90 = vector.broadcast %7 : vector<1x32xf32> to vector<8x32xf32>
    %91 = arith.addf %89, %90 : vector<8x32xf32>
    %cst_50 = arith.constant 5.000000e-01 : f32
    %92 = vector.broadcast %cst_50 : f32 to vector<8x32xf32>
    %93 = arith.mulf %92, %91 : vector<8x32xf32>
    %cst_51 = arith.constant 0.707106769 : f32
    %94 = vector.broadcast %cst_51 : f32 to vector<8x32xf32>
    %95 = arith.mulf %91, %94 : vector<8x32xf32>
    %96 = math.absf %95 : vector<8x32xf32>
    %cst_52 = arith.constant 0.327591091 : f32
    %97 = vector.broadcast %cst_52 : f32 to vector<8x32xf32>
    %98 = arith.mulf %97, %96 : vector<8x32xf32>
    %cst_53 = arith.constant 1.000000e+00 : f32
    %99 = vector.broadcast %cst_53 : f32 to vector<8x32xf32>
    %100 = arith.addf %99, %98 : vector<8x32xf32>
    %101 = tpu.reciprocal %100 {approx = true} : vector<8x32xf32> -> vector<8x32xf32>
    %cst_54 = arith.constant 1.06140542 : f32
    %102 = vector.broadcast %cst_54 : f32 to vector<8x32xf32>
    %103 = arith.mulf %102, %101 : vector<8x32xf32>
    %cst_55 = arith.constant -1.45315206 : f32
    %104 = vector.broadcast %cst_55 : f32 to vector<8x32xf32>
    %105 = arith.addf %103, %104 : vector<8x32xf32>
    %106 = arith.mulf %105, %101 : vector<8x32xf32>
    %cst_56 = arith.constant 1.42141378 : f32
    %107 = vector.broadcast %cst_56 : f32 to vector<8x32xf32>
    %108 = arith.addf %106, %107 : vector<8x32xf32>
    %109 = arith.mulf %108, %101 : vector<8x32xf32>
    %cst_57 = arith.constant -0.284496725 : f32
    %110 = vector.broadcast %cst_57 : f32 to vector<8x32xf32>
    %111 = arith.addf %109, %110 : vector<8x32xf32>
    %112 = arith.mulf %111, %101 : vector<8x32xf32>
    %cst_58 = arith.constant 0.254829586 : f32
    %113 = vector.broadcast %cst_58 : f32 to vector<8x32xf32>
    %114 = arith.addf %112, %113 : vector<8x32xf32>
    %115 = arith.mulf %114, %101 : vector<8x32xf32>
    %cst_59 = arith.constant 0.000000e+00 : f32
    %116 = vector.broadcast %cst_59 : f32 to vector<8x32xf32>
    %117 = arith.subf %116, %96 : vector<8x32xf32>
    %118 = arith.mulf %117, %96 : vector<8x32xf32>
    %119 = math.exp %118 : vector<8x32xf32>
    %120 = arith.mulf %115, %119 : vector<8x32xf32>
    %cst_60 = arith.constant 1.000000e+00 : f32
    %121 = vector.broadcast %cst_60 : f32 to vector<8x32xf32>
    %122 = arith.subf %121, %120 : vector<8x32xf32>
    %cst_61 = arith.constant 0.000000e+00 : f32
    %123 = vector.broadcast %cst_61 : f32 to vector<8x32xf32>
    %124 = arith.cmpf olt, %95, %123 : vector<8x32xf32>
    %cst_62 = arith.constant 0.000000e+00 : f32
    %125 = vector.broadcast %cst_62 : f32 to vector<8x32xf32>
    %126 = arith.subf %125, %122 : vector<8x32xf32>
    %127 = arith.select %124, %126, %122 : vector<8x32xi1>, vector<8x32xf32>
    %cst_63 = arith.constant 1.000000e+00 : f32
    %128 = vector.broadcast %cst_63 : f32 to vector<8x32xf32>
    %129 = arith.addf %128, %127 : vector<8x32xf32>
    %130 = arith.mulf %93, %129 : vector<8x32xf32>
    %cst_64 = arith.constant dense<0.000000e+00> : vector<8x8xf32>
    %131 = tpu.matmul %130, %5, %cst_64 {dimension_numbers = #tpu.dot_dimension_numbers<[1], [0], [0], [1], [0, 0, 1, 1], [], []>} : vector<8x32xf32>, vector<32x8xf32>, vector<8x8xf32> -> vector<8x8xf32>
    %132 = vector.broadcast %11 : vector<1x8xf32> to vector<8x8xf32>
    %133 = arith.addf %131, %132 : vector<8x8xf32>
    %134 = arith.addf %133, %46 : vector<8x8xf32>
    %cst_65 = arith.constant dense<0.000000e+00> : vector<8xf32>
    %135 = vector.multi_reduction <add>, %134, %cst_65 [1] : vector<8x8xf32> to vector<8xf32>
    %136 = vector.shape_cast %135 : vector<8xf32> to vector<8x1xf32>
    %cst_66 = arith.constant 8.000000e+00 : f32
    %137 = vector.broadcast %cst_66 : f32 to vector<8x1xf32>
    %138 = arith.divf %136, %137 : vector<8x1xf32>
    %139 = arith.mulf %134, %134 : vector<8x8xf32>
    %cst_67 = arith.constant dense<0.000000e+00> : vector<8xf32>
    %140 = vector.multi_reduction <add>, %139, %cst_67 [1] : vector<8x8xf32> to vector<8xf32>
    %141 = vector.shape_cast %140 : vector<8xf32> to vector<8x1xf32>
    %cst_68 = arith.constant 8.000000e+00 : f32
    %142 = vector.broadcast %cst_68 : f32 to vector<8x1xf32>
    %143 = arith.divf %141, %142 : vector<8x1xf32>
    %144 = arith.mulf %138, %138 : vector<8x1xf32>
    %145 = arith.subf %143, %144 : vector<8x1xf32>
    %cst_69 = arith.constant 0.000000e+00 : f32
    %146 = vector.broadcast %cst_69 : f32 to vector<8x1xf32>
    %147 = arith.maximumf %145, %146 : vector<8x1xf32>
    %148 = vector.broadcast %138 : vector<8x1xf32> to vector<8x8xf32>
    %149 = arith.subf %134, %148 : vector<8x8xf32>
    %cst_70 = arith.constant 9.99999974E-6 : f32
    %150 = vector.broadcast %cst_70 : f32 to vector<8x1xf32>
    %151 = arith.addf %147, %150 : vector<8x1xf32>
    %152 = math.rsqrt %151 : vector<8x1xf32>
    %153 = vector.broadcast %152 : vector<8x1xf32> to vector<8x8xf32>
    %154 = arith.mulf %149, %153 : vector<8x8xf32>
    %155 = vector.broadcast %12 : vector<1x8xf32> to vector<8x8xf32>
    %156 = arith.mulf %154, %155 : vector<8x8xf32>
    %157 = vector.broadcast %13 : vector<1x8xf32> to vector<8x8xf32>
    %158 = arith.addf %156, %157 : vector<8x8xf32>
    %159 = vector.broadcast %14 : vector<1x8xf32> to vector<8x8xf32>
    %160 = arith.mulf %159, %46 : vector<8x8xf32>
    %161 = vector.broadcast %15 : vector<1x8xf32> to vector<8x8xf32>
    %162 = arith.mulf %161, %158 : vector<8x8xf32>
    %163 = arith.addf %160, %162 : vector<8x8xf32>
    %164 = vector.broadcast %16 : vector<1x8xf32> to vector<8x8xf32>
    %165 = arith.addf %163, %164 : vector<8x8xf32>
    %c8_i32 = arith.constant 8 : i32
    %166 = arith.muli %c0_i32, %c8_i32 : i32
    %167 = tpu.assume_multiple %166, 8 : i32
    %168 = arith.index_cast %167 : i32 to index
    %c0_71 = arith.constant 0 : index
    %169 = vector.load %arg11[%168, %c0_71] : memref<48x8xf32, #tpu.memory_space<vmem>>, vector<8x8xf32>
    tpu.vector_store %arg11[%168, %c0_71], %165 {strides = array<i32>} : memref<48x8xf32, #tpu.memory_space<vmem>>, vector<8x8xf32>,
    %c1_i32 = arith.constant 1 : i32
    %cst_72 = arith.constant dense<0.000000e+00> : vector<8x32xf32>
    %170 = tpu.matmul %165, %3, %cst_72 {dimension_numbers = #tpu.dot_dimension_numbers<[1], [0], [0], [1], [0, 0, 1, 1], [], []>} : vector<8x8xf32>, vector<8x32xf32>, vector<8x32xf32> -> vector<8x32xf32>
    %171 = vector.broadcast %6 : vector<1x32xf32> to vector<8x32xf32>
    %172 = arith.addf %170, %171 : vector<8x32xf32>
    %cst_73 = arith.constant 5.000000e-01 : f32
    %173 = vector.broadcast %cst_73 : f32 to vector<8x32xf32>
    %174 = arith.mulf %173, %172 : vector<8x32xf32>
    %cst_74 = arith.constant 0.707106769 : f32
    %175 = vector.broadcast %cst_74 : f32 to vector<8x32xf32>
    %176 = arith.mulf %172, %175 : vector<8x32xf32>
    %177 = math.absf %176 : vector<8x32xf32>
    %cst_75 = arith.constant 0.327591091 : f32
    %178 = vector.broadcast %cst_75 : f32 to vector<8x32xf32>
    %179 = arith.mulf %178, %177 : vector<8x32xf32>
    %cst_76 = arith.constant 1.000000e+00 : f32
    %180 = vector.broadcast %cst_76 : f32 to vector<8x32xf32>
    %181 = arith.addf %180, %179 : vector<8x32xf32>
    %182 = tpu.reciprocal %181 {approx = true} : vector<8x32xf32> -> vector<8x32xf32>
    %cst_77 = arith.constant 1.06140542 : f32
    %183 = vector.broadcast %cst_77 : f32 to vector<8x32xf32>
    %184 = arith.mulf %183, %182 : vector<8x32xf32>
    %cst_78 = arith.constant -1.45315206 : f32
    %185 = vector.broadcast %cst_78 : f32 to vector<8x32xf32>
    %186 = arith.addf %184, %185 : vector<8x32xf32>
    %187 = arith.mulf %186, %182 : vector<8x32xf32>
    %cst_79 = arith.constant 1.42141378 : f32
    %188 = vector.broadcast %cst_79 : f32 to vector<8x32xf32>
    %189 = arith.addf %187, %188 : vector<8x32xf32>
    %190 = arith.mulf %189, %182 : vector<8x32xf32>
    %cst_80 = arith.constant -0.284496725 : f32
    %191 = vector.broadcast %cst_80 : f32 to vector<8x32xf32>
    %192 = arith.addf %190, %191 : vector<8x32xf32>
    %193 = arith.mulf %192, %182 : vector<8x32xf32>
    %cst_81 = arith.constant 0.254829586 : f32
    %194 = vector.broadcast %cst_81 : f32 to vector<8x32xf32>
    %195 = arith.addf %193, %194 : vector<8x32xf32>
    %196 = arith.mulf %195, %182 : vector<8x32xf32>
    %cst_82 = arith.constant 0.000000e+00 : f32
    %197 = vector.broadcast %cst_82 : f32 to vector<8x32xf32>
    %198 = arith.subf %197, %177 : vector<8x32xf32>
    %199 = arith.mulf %198, %177 : vector<8x32xf32>
    %200 = math.exp %199 : vector<8x32xf32>
    %201 = arith.mulf %196, %200 : vector<8x32xf32>
    %cst_83 = arith.constant 1.000000e+00 : f32
    %202 = vector.broadcast %cst_83 : f32 to vector<8x32xf32>
    %203 = arith.subf %202, %201 : vector<8x32xf32>
    %cst_84 = arith.constant 0.000000e+00 : f32
    %204 = vector.broadcast %cst_84 : f32 to vector<8x32xf32>
    %205 = arith.cmpf olt, %176, %204 : vector<8x32xf32>
    %cst_85 = arith.constant 0.000000e+00 : f32
    %206 = vector.broadcast %cst_85 : f32 to vector<8x32xf32>
    %207 = arith.subf %206, %203 : vector<8x32xf32>
    %208 = arith.select %205, %207, %203 : vector<8x32xi1>, vector<8x32xf32>
    %cst_86 = arith.constant 1.000000e+00 : f32
    %209 = vector.broadcast %cst_86 : f32 to vector<8x32xf32>
    %210 = arith.addf %209, %208 : vector<8x32xf32>
    %211 = arith.mulf %174, %210 : vector<8x32xf32>
    %cst_87 = arith.constant dense<0.000000e+00> : vector<8x32xf32>
    %212 = tpu.matmul %211, %4, %cst_87 {dimension_numbers = #tpu.dot_dimension_numbers<[1], [0], [0], [1], [0, 0, 1, 1], [], []>} : vector<8x32xf32>, vector<32x32xf32>, vector<8x32xf32> -> vector<8x32xf32>
    %213 = vector.broadcast %7 : vector<1x32xf32> to vector<8x32xf32>
    %214 = arith.addf %212, %213 : vector<8x32xf32>
    %cst_88 = arith.constant 5.000000e-01 : f32
    %215 = vector.broadcast %cst_88 : f32 to vector<8x32xf32>
    %216 = arith.mulf %215, %214 : vector<8x32xf32>
    %cst_89 = arith.constant 0.707106769 : f32
    %217 = vector.broadcast %cst_89 : f32 to vector<8x32xf32>
    %218 = arith.mulf %214, %217 : vector<8x32xf32>
    %219 = math.absf %218 : vector<8x32xf32>
    %cst_90 = arith.constant 0.327591091 : f32
    %220 = vector.broadcast %cst_90 : f32 to vector<8x32xf32>
    %221 = arith.mulf %220, %219 : vector<8x32xf32>
    %cst_91 = arith.constant 1.000000e+00 : f32
    %222 = vector.broadcast %cst_91 : f32 to vector<8x32xf32>
    %223 = arith.addf %222, %221 : vector<8x32xf32>
    %224 = tpu.reciprocal %223 {approx = true} : vector<8x32xf32> -> vector<8x32xf32>
    %cst_92 = arith.constant 1.06140542 : f32
    %225 = vector.broadcast %cst_92 : f32 to vector<8x32xf32>
    %226 = arith.mulf %225, %224 : vector<8x32xf32>
    %cst_93 = arith.constant -1.45315206 : f32
    %227 = vector.broadcast %cst_93 : f32 to vector<8x32xf32>
    %228 = arith.addf %226, %227 : vector<8x32xf32>
    %229 = arith.mulf %228, %224 : vector<8x32xf32>
    %cst_94 = arith.constant 1.42141378 : f32
    %230 = vector.broadcast %cst_94 : f32 to vector<8x32xf32>
    %231 = arith.addf %229, %230 : vector<8x32xf32>
    %232 = arith.mulf %231, %224 : vector<8x32xf32>
    %cst_95 = arith.constant -0.284496725 : f32
    %233 = vector.broadcast %cst_95 : f32 to vector<8x32xf32>
    %234 = arith.addf %232, %233 : vector<8x32xf32>
    %235 = arith.mulf %234, %224 : vector<8x32xf32>
    %cst_96 = arith.constant 0.254829586 : f32
    %236 = vector.broadcast %cst_96 : f32 to vector<8x32xf32>
    %237 = arith.addf %235, %236 : vector<8x32xf32>
    %238 = arith.mulf %237, %224 : vector<8x32xf32>
    %cst_97 = arith.constant 0.000000e+00 : f32
    %239 = vector.broadcast %cst_97 : f32 to vector<8x32xf32>
    %240 = arith.subf %239, %219 : vector<8x32xf32>
    %241 = arith.mulf %240, %219 : vector<8x32xf32>
    %242 = math.exp %241 : vector<8x32xf32>
    %243 = arith.mulf %238, %242 : vector<8x32xf32>
    %cst_98 = arith.constant 1.000000e+00 : f32
    %244 = vector.broadcast %cst_98 : f32 to vector<8x32xf32>
    %245 = arith.subf %244, %243 : vector<8x32xf32>
    %cst_99 = arith.constant 0.000000e+00 : f32
    %246 = vector.broadcast %cst_99 : f32 to vector<8x32xf32>
    %247 = arith.cmpf olt, %218, %246 : vector<8x32xf32>
    %cst_100 = arith.constant 0.000000e+00 : f32
    %248 = vector.broadcast %cst_100 : f32 to vector<8x32xf32>
    %249 = arith.subf %248, %245 : vector<8x32xf32>
    %250 = arith.select %247, %249, %245 : vector<8x32xi1>, vector<8x32xf32>
    %cst_101 = arith.constant 1.000000e+00 : f32
    %251 = vector.broadcast %cst_101 : f32 to vector<8x32xf32>
    %252 = arith.addf %251, %250 : vector<8x32xf32>
    %253 = arith.mulf %216, %252 : vector<8x32xf32>
    %cst_102 = arith.constant dense<0.000000e+00> : vector<8x8xf32>
    %254 = tpu.matmul %253, %5, %cst_102 {dimension_numbers = #tpu.dot_dimension_numbers<[1], [0], [0], [1], [0, 0, 1, 1], [], []>} : vector<8x32xf32>, vector<32x8xf32>, vector<8x8xf32> -> vector<8x8xf32>
    %255 = vector.broadcast %11 : vector<1x8xf32> to vector<8x8xf32>
    %256 = arith.addf %254, %255 : vector<8x8xf32>
    %257 = arith.addf %256, %165 : vector<8x8xf32>
    %cst_103 = arith.constant dense<0.000000e+00> : vector<8xf32>
    %258 = vector.multi_reduction <add>, %257, %cst_103 [1] : vector<8x8xf32> to vector<8xf32>
    %259 = vector.shape_cast %258 : vector<8xf32> to vector<8x1xf32>
    %cst_104 = arith.constant 8.000000e+00 : f32
    %260 = vector.broadcast %cst_104 : f32 to vector<8x1xf32>
    %261 = arith.divf %259, %260 : vector<8x1xf32>
    %262 = arith.mulf %257, %257 : vector<8x8xf32>
    %cst_105 = arith.constant dense<0.000000e+00> : vector<8xf32>
    %263 = vector.multi_reduction <add>, %262, %cst_105 [1] : vector<8x8xf32> to vector<8xf32>
    %264 = vector.shape_cast %263 : vector<8xf32> to vector<8x1xf32>
    %cst_106 = arith.constant 8.000000e+00 : f32
    %265 = vector.broadcast %cst_106 : f32 to vector<8x1xf32>
    %266 = arith.divf %264, %265 : vector<8x1xf32>
    %267 = arith.mulf %261, %261 : vector<8x1xf32>
    %268 = arith.subf %266, %267 : vector<8x1xf32>
    %cst_107 = arith.constant 0.000000e+00 : f32
    %269 = vector.broadcast %cst_107 : f32 to vector<8x1xf32>
    %270 = arith.maximumf %268, %269 : vector<8x1xf32>
    %271 = vector.broadcast %261 : vector<8x1xf32> to vector<8x8xf32>
    %272 = arith.subf %257, %271 : vector<8x8xf32>
    %cst_108 = arith.constant 9.99999974E-6 : f32
    %273 = vector.broadcast %cst_108 : f32 to vector<8x1xf32>
    %274 = arith.addf %270, %273 : vector<8x1xf32>
    %275 = math.rsqrt %274 : vector<8x1xf32>
    %276 = vector.broadcast %275 : vector<8x1xf32> to vector<8x8xf32>
    %277 = arith.mulf %272, %276 : vector<8x8xf32>
    %278 = vector.broadcast %12 : vector<1x8xf32> to vector<8x8xf32>
    %279 = arith.mulf %277, %278 : vector<8x8xf32>
    %280 = vector.broadcast %13 : vector<1x8xf32> to vector<8x8xf32>
    %281 = arith.addf %279, %280 : vector<8x8xf32>
    %282 = vector.broadcast %14 : vector<1x8xf32> to vector<8x8xf32>
    %283 = arith.mulf %282, %165 : vector<8x8xf32>
    %284 = vector.broadcast %15 : vector<1x8xf32> to vector<8x8xf32>
    %285 = arith.mulf %284, %281 : vector<8x8xf32>
    %286 = arith.addf %283, %285 : vector<8x8xf32>
    %287 = vector.broadcast %16 : vector<1x8xf32> to vector<8x8xf32>
    %288 = arith.addf %286, %287 : vector<8x8xf32>
    %c8_i32_109 = arith.constant 8 : i32
    %289 = arith.muli %c1_i32, %c8_i32_109 : i32
    %290 = tpu.assume_multiple %289, 8 : i32
    %291 = arith.index_cast %290 : i32 to index
    %c0_110 = arith.constant 0 : index
    %292 = vector.load %arg11[%291, %c0_110] : memref<48x8xf32, #tpu.memory_space<vmem>>, vector<8x8xf32>
    tpu.vector_store %arg11[%291, %c0_110], %288 {strides = array<i32>} : memref<48x8xf32, #tpu.memory_space<vmem>>, vector<8x8xf32>,
    %c2_i32 = arith.constant 2 : i32
    %cst_111 = arith.constant dense<0.000000e+00> : vector<8x32xf32>
    %293 = tpu.matmul %288, %3, %cst_111 {dimension_numbers = #tpu.dot_dimension_numbers<[1], [0], [0], [1], [0, 0, 1, 1], [], []>} : vector<8x8xf32>, vector<8x32xf32>, vector<8x32xf32> -> vector<8x32xf32>
    %294 = vector.broadcast %6 : vector<1x32xf32> to vector<8x32xf32>
    %295 = arith.addf %293, %294 : vector<8x32xf32>
    %cst_112 = arith.constant 5.000000e-01 : f32
    %296 = vector.broadcast %cst_112 : f32 to vector<8x32xf32>
    %297 = arith.mulf %296, %295 : vector<8x32xf32>
    %cst_113 = arith.constant 0.707106769 : f32
    %298 = vector.broadcast %cst_113 : f32 to vector<8x32xf32>
    %299 = arith.mulf %295, %298 : vector<8x32xf32>
    %300 = math.absf %299 : vector<8x32xf32>
    %cst_114 = arith.constant 0.327591091 : f32
    %301 = vector.broadcast %cst_114 : f32 to vector<8x32xf32>
    %302 = arith.mulf %301, %300 : vector<8x32xf32>
    %cst_115 = arith.constant 1.000000e+00 : f32
    %303 = vector.broadcast %cst_115 : f32 to vector<8x32xf32>
    %304 = arith.addf %303, %302 : vector<8x32xf32>
    %305 = tpu.reciprocal %304 {approx = true} : vector<8x32xf32> -> vector<8x32xf32>
    %cst_116 = arith.constant 1.06140542 : f32
    %306 = vector.broadcast %cst_116 : f32 to vector<8x32xf32>
    %307 = arith.mulf %306, %305 : vector<8x32xf32>
    %cst_117 = arith.constant -1.45315206 : f32
    %308 = vector.broadcast %cst_117 : f32 to vector<8x32xf32>
    %309 = arith.addf %307, %308 : vector<8x32xf32>
    %310 = arith.mulf %309, %305 : vector<8x32xf32>
    %cst_118 = arith.constant 1.42141378 : f32
    %311 = vector.broadcast %cst_118 : f32 to vector<8x32xf32>
    %312 = arith.addf %310, %311 : vector<8x32xf32>
    %313 = arith.mulf %312, %305 : vector<8x32xf32>
    %cst_119 = arith.constant -0.284496725 : f32
    %314 = vector.broadcast %cst_119 : f32 to vector<8x32xf32>
    %315 = arith.addf %313, %314 : vector<8x32xf32>
    %316 = arith.mulf %315, %305 : vector<8x32xf32>
    %cst_120 = arith.constant 0.254829586 : f32
    %317 = vector.broadcast %cst_120 : f32 to vector<8x32xf32>
    %318 = arith.addf %316, %317 : vector<8x32xf32>
    %319 = arith.mulf %318, %305 : vector<8x32xf32>
    %cst_121 = arith.constant 0.000000e+00 : f32
    %320 = vector.broadcast %cst_121 : f32 to vector<8x32xf32>
    %321 = arith.subf %320, %300 : vector<8x32xf32>
    %322 = arith.mulf %321, %300 : vector<8x32xf32>
    %323 = math.exp %322 : vector<8x32xf32>
    %324 = arith.mulf %319, %323 : vector<8x32xf32>
    %cst_122 = arith.constant 1.000000e+00 : f32
    %325 = vector.broadcast %cst_122 : f32 to vector<8x32xf32>
    %326 = arith.subf %325, %324 : vector<8x32xf32>
    %cst_123 = arith.constant 0.000000e+00 : f32
    %327 = vector.broadcast %cst_123 : f32 to vector<8x32xf32>
    %328 = arith.cmpf olt, %299, %327 : vector<8x32xf32>
    %cst_124 = arith.constant 0.000000e+00 : f32
    %329 = vector.broadcast %cst_124 : f32 to vector<8x32xf32>
    %330 = arith.subf %329, %326 : vector<8x32xf32>
    %331 = arith.select %328, %330, %326 : vector<8x32xi1>, vector<8x32xf32>
    %cst_125 = arith.constant 1.000000e+00 : f32
    %332 = vector.broadcast %cst_125 : f32 to vector<8x32xf32>
    %333 = arith.addf %332, %331 : vector<8x32xf32>
    %334 = arith.mulf %297, %333 : vector<8x32xf32>
    %cst_126 = arith.constant dense<0.000000e+00> : vector<8x32xf32>
    %335 = tpu.matmul %334, %4, %cst_126 {dimension_numbers = #tpu.dot_dimension_numbers<[1], [0], [0], [1], [0, 0, 1, 1], [], []>} : vector<8x32xf32>, vector<32x32xf32>, vector<8x32xf32> -> vector<8x32xf32>
    %336 = vector.broadcast %7 : vector<1x32xf32> to vector<8x32xf32>
    %337 = arith.addf %335, %336 : vector<8x32xf32>
    %cst_127 = arith.constant 5.000000e-01 : f32
    %338 = vector.broadcast %cst_127 : f32 to vector<8x32xf32>
    %339 = arith.mulf %338, %337 : vector<8x32xf32>
    %cst_128 = arith.constant 0.707106769 : f32
    %340 = vector.broadcast %cst_128 : f32 to vector<8x32xf32>
    %341 = arith.mulf %337, %340 : vector<8x32xf32>
    %342 = math.absf %341 : vector<8x32xf32>
    %cst_129 = arith.constant 0.327591091 : f32
    %343 = vector.broadcast %cst_129 : f32 to vector<8x32xf32>
    %344 = arith.mulf %343, %342 : vector<8x32xf32>
    %cst_130 = arith.constant 1.000000e+00 : f32
    %345 = vector.broadcast %cst_130 : f32 to vector<8x32xf32>
    %346 = arith.addf %345, %344 : vector<8x32xf32>
    %347 = tpu.reciprocal %346 {approx = true} : vector<8x32xf32> -> vector<8x32xf32>
    %cst_131 = arith.constant 1.06140542 : f32
    %348 = vector.broadcast %cst_131 : f32 to vector<8x32xf32>
    %349 = arith.mulf %348, %347 : vector<8x32xf32>
    %cst_132 = arith.constant -1.45315206 : f32
    %350 = vector.broadcast %cst_132 : f32 to vector<8x32xf32>
    %351 = arith.addf %349, %350 : vector<8x32xf32>
    %352 = arith.mulf %351, %347 : vector<8x32xf32>
    %cst_133 = arith.constant 1.42141378 : f32
    %353 = vector.broadcast %cst_133 : f32 to vector<8x32xf32>
    %354 = arith.addf %352, %353 : vector<8x32xf32>
    %355 = arith.mulf %354, %347 : vector<8x32xf32>
    %cst_134 = arith.constant -0.284496725 : f32
    %356 = vector.broadcast %cst_134 : f32 to vector<8x32xf32>
    %357 = arith.addf %355, %356 : vector<8x32xf32>
    %358 = arith.mulf %357, %347 : vector<8x32xf32>
    %cst_135 = arith.constant 0.254829586 : f32
    %359 = vector.broadcast %cst_135 : f32 to vector<8x32xf32>
    %360 = arith.addf %358, %359 : vector<8x32xf32>
    %361 = arith.mulf %360, %347 : vector<8x32xf32>
    %cst_136 = arith.constant 0.000000e+00 : f32
    %362 = vector.broadcast %cst_136 : f32 to vector<8x32xf32>
    %363 = arith.subf %362, %342 : vector<8x32xf32>
    %364 = arith.mulf %363, %342 : vector<8x32xf32>
    %365 = math.exp %364 : vector<8x32xf32>
    %366 = arith.mulf %361, %365 : vector<8x32xf32>
    %cst_137 = arith.constant 1.000000e+00 : f32
    %367 = vector.broadcast %cst_137 : f32 to vector<8x32xf32>
    %368 = arith.subf %367, %366 : vector<8x32xf32>
    %cst_138 = arith.constant 0.000000e+00 : f32
    %369 = vector.broadcast %cst_138 : f32 to vector<8x32xf32>
    %370 = arith.cmpf olt, %341, %369 : vector<8x32xf32>
    %cst_139 = arith.constant 0.000000e+00 : f32
    %371 = vector.broadcast %cst_139 : f32 to vector<8x32xf32>
    %372 = arith.subf %371, %368 : vector<8x32xf32>
    %373 = arith.select %370, %372, %368 : vector<8x32xi1>, vector<8x32xf32>
    %cst_140 = arith.constant 1.000000e+00 : f32
    %374 = vector.broadcast %cst_140 : f32 to vector<8x32xf32>
    %375 = arith.addf %374, %373 : vector<8x32xf32>
    %376 = arith.mulf %339, %375 : vector<8x32xf32>
    %cst_141 = arith.constant dense<0.000000e+00> : vector<8x8xf32>
    %377 = tpu.matmul %376, %5, %cst_141 {dimension_numbers = #tpu.dot_dimension_numbers<[1], [0], [0], [1], [0, 0, 1, 1], [], []>} : vector<8x32xf32>, vector<32x8xf32>, vector<8x8xf32> -> vector<8x8xf32>
    %378 = vector.broadcast %11 : vector<1x8xf32> to vector<8x8xf32>
    %379 = arith.addf %377, %378 : vector<8x8xf32>
    %380 = arith.addf %379, %288 : vector<8x8xf32>
    %cst_142 = arith.constant dense<0.000000e+00> : vector<8xf32>
    %381 = vector.multi_reduction <add>, %380, %cst_142 [1] : vector<8x8xf32> to vector<8xf32>
    %382 = vector.shape_cast %381 : vector<8xf32> to vector<8x1xf32>
    %cst_143 = arith.constant 8.000000e+00 : f32
    %383 = vector.broadcast %cst_143 : f32 to vector<8x1xf32>
    %384 = arith.divf %382, %383 : vector<8x1xf32>
    %385 = arith.mulf %380, %380 : vector<8x8xf32>
    %cst_144 = arith.constant dense<0.000000e+00> : vector<8xf32>
    %386 = vector.multi_reduction <add>, %385, %cst_144 [1] : vector<8x8xf32> to vector<8xf32>
    %387 = vector.shape_cast %386 : vector<8xf32> to vector<8x1xf32>
    %cst_145 = arith.constant 8.000000e+00 : f32
    %388 = vector.broadcast %cst_145 : f32 to vector<8x1xf32>
    %389 = arith.divf %387, %388 : vector<8x1xf32>
    %390 = arith.mulf %384, %384 : vector<8x1xf32>
    %391 = arith.subf %389, %390 : vector<8x1xf32>
    %cst_146 = arith.constant 0.000000e+00 : f32
    %392 = vector.broadcast %cst_146 : f32 to vector<8x1xf32>
    %393 = arith.maximumf %391, %392 : vector<8x1xf32>
    %394 = vector.broadcast %384 : vector<8x1xf32> to vector<8x8xf32>
    %395 = arith.subf %380, %394 : vector<8x8xf32>
    %cst_147 = arith.constant 9.99999974E-6 : f32
    %396 = vector.broadcast %cst_147 : f32 to vector<8x1xf32>
    %397 = arith.addf %393, %396 : vector<8x1xf32>
    %398 = math.rsqrt %397 : vector<8x1xf32>
    %399 = vector.broadcast %398 : vector<8x1xf32> to vector<8x8xf32>
    %400 = arith.mulf %395, %399 : vector<8x8xf32>
    %401 = vector.broadcast %12 : vector<1x8xf32> to vector<8x8xf32>
    %402 = arith.mulf %400, %401 : vector<8x8xf32>
    %403 = vector.broadcast %13 : vector<1x8xf32> to vector<8x8xf32>
    %404 = arith.addf %402, %403 : vector<8x8xf32>
    %405 = vector.broadcast %14 : vector<1x8xf32> to vector<8x8xf32>
    %406 = arith.mulf %405, %288 : vector<8x8xf32>
    %407 = vector.broadcast %15 : vector<1x8xf32> to vector<8x8xf32>
    %408 = arith.mulf %407, %404 : vector<8x8xf32>
    %409 = arith.addf %406, %408 : vector<8x8xf32>
    %410 = vector.broadcast %16 : vector<1x8xf32> to vector<8x8xf32>
    %411 = arith.addf %409, %410 : vector<8x8xf32>
    %c8_i32_148 = arith.constant 8 : i32
    %412 = arith.muli %c2_i32, %c8_i32_148 : i32
    %413 = tpu.assume_multiple %412, 8 : i32
    %414 = arith.index_cast %413 : i32 to index
    %c0_149 = arith.constant 0 : index
    %415 = vector.load %arg11[%414, %c0_149] : memref<48x8xf32, #tpu.memory_space<vmem>>, vector<8x8xf32>
    tpu.vector_store %arg11[%414, %c0_149], %411 {strides = array<i32>} : memref<48x8xf32, #tpu.memory_space<vmem>>, vector<8x8xf32>,
    %c3_i32 = arith.constant 3 : i32
    %cst_150 = arith.constant dense<0.000000e+00> : vector<8x32xf32>
    %416 = tpu.matmul %411, %3, %cst_150 {dimension_numbers = #tpu.dot_dimension_numbers<[1], [0], [0], [1], [0, 0, 1, 1], [], []>} : vector<8x8xf32>, vector<8x32xf32>, vector<8x32xf32> -> vector<8x32xf32>
    %417 = vector.broadcast %6 : vector<1x32xf32> to vector<8x32xf32>
    %418 = arith.addf %416, %417 : vector<8x32xf32>
    %cst_151 = arith.constant 5.000000e-01 : f32
    %419 = vector.broadcast %cst_151 : f32 to vector<8x32xf32>
    %420 = arith.mulf %419, %418 : vector<8x32xf32>
    %cst_152 = arith.constant 0.707106769 : f32
    %421 = vector.broadcast %cst_152 : f32 to vector<8x32xf32>
    %422 = arith.mulf %418, %421 : vector<8x32xf32>
    %423 = math.absf %422 : vector<8x32xf32>
    %cst_153 = arith.constant 0.327591091 : f32
    %424 = vector.broadcast %cst_153 : f32 to vector<8x32xf32>
    %425 = arith.mulf %424, %423 : vector<8x32xf32>
    %cst_154 = arith.constant 1.000000e+00 : f32
    %426 = vector.broadcast %cst_154 : f32 to vector<8x32xf32>
    %427 = arith.addf %426, %425 : vector<8x32xf32>
    %428 = tpu.reciprocal %427 {approx = true} : vector<8x32xf32> -> vector<8x32xf32>
    %cst_155 = arith.constant 1.06140542 : f32
    %429 = vector.broadcast %cst_155 : f32 to vector<8x32xf32>
    %430 = arith.mulf %429, %428 : vector<8x32xf32>
    %cst_156 = arith.constant -1.45315206 : f32
    %431 = vector.broadcast %cst_156 : f32 to vector<8x32xf32>
    %432 = arith.addf %430, %431 : vector<8x32xf32>
    %433 = arith.mulf %432, %428 : vector<8x32xf32>
    %cst_157 = arith.constant 1.42141378 : f32
    %434 = vector.broadcast %cst_157 : f32 to vector<8x32xf32>
    %435 = arith.addf %433, %434 : vector<8x32xf32>
    %436 = arith.mulf %435, %428 : vector<8x32xf32>
    %cst_158 = arith.constant -0.284496725 : f32
    %437 = vector.broadcast %cst_158 : f32 to vector<8x32xf32>
    %438 = arith.addf %436, %437 : vector<8x32xf32>
    %439 = arith.mulf %438, %428 : vector<8x32xf32>
    %cst_159 = arith.constant 0.254829586 : f32
    %440 = vector.broadcast %cst_159 : f32 to vector<8x32xf32>
    %441 = arith.addf %439, %440 : vector<8x32xf32>
    %442 = arith.mulf %441, %428 : vector<8x32xf32>
    %cst_160 = arith.constant 0.000000e+00 : f32
    %443 = vector.broadcast %cst_160 : f32 to vector<8x32xf32>
    %444 = arith.subf %443, %423 : vector<8x32xf32>
    %445 = arith.mulf %444, %423 : vector<8x32xf32>
    %446 = math.exp %445 : vector<8x32xf32>
    %447 = arith.mulf %442, %446 : vector<8x32xf32>
    %cst_161 = arith.constant 1.000000e+00 : f32
    %448 = vector.broadcast %cst_161 : f32 to vector<8x32xf32>
    %449 = arith.subf %448, %447 : vector<8x32xf32>
    %cst_162 = arith.constant 0.000000e+00 : f32
    %450 = vector.broadcast %cst_162 : f32 to vector<8x32xf32>
    %451 = arith.cmpf olt, %422, %450 : vector<8x32xf32>
    %cst_163 = arith.constant 0.000000e+00 : f32
    %452 = vector.broadcast %cst_163 : f32 to vector<8x32xf32>
    %453 = arith.subf %452, %449 : vector<8x32xf32>
    %454 = arith.select %451, %453, %449 : vector<8x32xi1>, vector<8x32xf32>
    %cst_164 = arith.constant 1.000000e+00 : f32
    %455 = vector.broadcast %cst_164 : f32 to vector<8x32xf32>
    %456 = arith.addf %455, %454 : vector<8x32xf32>
    %457 = arith.mulf %420, %456 : vector<8x32xf32>
    %cst_165 = arith.constant dense<0.000000e+00> : vector<8x32xf32>
    %458 = tpu.matmul %457, %4, %cst_165 {dimension_numbers = #tpu.dot_dimension_numbers<[1], [0], [0], [1], [0, 0, 1, 1], [], []>} : vector<8x32xf32>, vector<32x32xf32>, vector<8x32xf32> -> vector<8x32xf32>
    %459 = vector.broadcast %7 : vector<1x32xf32> to vector<8x32xf32>
    %460 = arith.addf %458, %459 : vector<8x32xf32>
    %cst_166 = arith.constant 5.000000e-01 : f32
    %461 = vector.broadcast %cst_166 : f32 to vector<8x32xf32>
    %462 = arith.mulf %461, %460 : vector<8x32xf32>
    %cst_167 = arith.constant 0.707106769 : f32
    %463 = vector.broadcast %cst_167 : f32 to vector<8x32xf32>
    %464 = arith.mulf %460, %463 : vector<8x32xf32>
    %465 = math.absf %464 : vector<8x32xf32>
    %cst_168 = arith.constant 0.327591091 : f32
    %466 = vector.broadcast %cst_168 : f32 to vector<8x32xf32>
    %467 = arith.mulf %466, %465 : vector<8x32xf32>
    %cst_169 = arith.constant 1.000000e+00 : f32
    %468 = vector.broadcast %cst_169 : f32 to vector<8x32xf32>
    %469 = arith.addf %468, %467 : vector<8x32xf32>
    %470 = tpu.reciprocal %469 {approx = true} : vector<8x32xf32> -> vector<8x32xf32>
    %cst_170 = arith.constant 1.06140542 : f32
    %471 = vector.broadcast %cst_170 : f32 to vector<8x32xf32>
    %472 = arith.mulf %471, %470 : vector<8x32xf32>
    %cst_171 = arith.constant -1.45315206 : f32
    %473 = vector.broadcast %cst_171 : f32 to vector<8x32xf32>
    %474 = arith.addf %472, %473 : vector<8x32xf32>
    %475 = arith.mulf %474, %470 : vector<8x32xf32>
    %cst_172 = arith.constant 1.42141378 : f32
    %476 = vector.broadcast %cst_172 : f32 to vector<8x32xf32>
    %477 = arith.addf %475, %476 : vector<8x32xf32>
    %478 = arith.mulf %477, %470 : vector<8x32xf32>
    %cst_173 = arith.constant -0.284496725 : f32
    %479 = vector.broadcast %cst_173 : f32 to vector<8x32xf32>
    %480 = arith.addf %478, %479 : vector<8x32xf32>
    %481 = arith.mulf %480, %470 : vector<8x32xf32>
    %cst_174 = arith.constant 0.254829586 : f32
    %482 = vector.broadcast %cst_174 : f32 to vector<8x32xf32>
    %483 = arith.addf %481, %482 : vector<8x32xf32>
    %484 = arith.mulf %483, %470 : vector<8x32xf32>
    %cst_175 = arith.constant 0.000000e+00 : f32
    %485 = vector.broadcast %cst_175 : f32 to vector<8x32xf32>
    %486 = arith.subf %485, %465 : vector<8x32xf32>
    %487 = arith.mulf %486, %465 : vector<8x32xf32>
    %488 = math.exp %487 : vector<8x32xf32>
    %489 = arith.mulf %484, %488 : vector<8x32xf32>
    %cst_176 = arith.constant 1.000000e+00 : f32
    %490 = vector.broadcast %cst_176 : f32 to vector<8x32xf32>
    %491 = arith.subf %490, %489 : vector<8x32xf32>
    %cst_177 = arith.constant 0.000000e+00 : f32
    %492 = vector.broadcast %cst_177 : f32 to vector<8x32xf32>
    %493 = arith.cmpf olt, %464, %492 : vector<8x32xf32>
    %cst_178 = arith.constant 0.000000e+00 : f32
    %494 = vector.broadcast %cst_178 : f32 to vector<8x32xf32>
    %495 = arith.subf %494, %491 : vector<8x32xf32>
    %496 = arith.select %493, %495, %491 : vector<8x32xi1>, vector<8x32xf32>
    %cst_179 = arith.constant 1.000000e+00 : f32
    %497 = vector.broadcast %cst_179 : f32 to vector<8x32xf32>
    %498 = arith.addf %497, %496 : vector<8x32xf32>
    %499 = arith.mulf %462, %498 : vector<8x32xf32>
    %cst_180 = arith.constant dense<0.000000e+00> : vector<8x8xf32>
    %500 = tpu.matmul %499, %5, %cst_180 {dimension_numbers = #tpu.dot_dimension_numbers<[1], [0], [0], [1], [0, 0, 1, 1], [], []>} : vector<8x32xf32>, vector<32x8xf32>, vector<8x8xf32> -> vector<8x8xf32>
    %501 = vector.broadcast %11 : vector<1x8xf32> to vector<8x8xf32>
    %502 = arith.addf %500, %501 : vector<8x8xf32>
    %503 = arith.addf %502, %411 : vector<8x8xf32>
    %cst_181 = arith.constant dense<0.000000e+00> : vector<8xf32>
    %504 = vector.multi_reduction <add>, %503, %cst_181 [1] : vector<8x8xf32> to vector<8xf32>
    %505 = vector.shape_cast %504 : vector<8xf32> to vector<8x1xf32>
    %cst_182 = arith.constant 8.000000e+00 : f32
    %506 = vector.broadcast %cst_182 : f32 to vector<8x1xf32>
    %507 = arith.divf %505, %506 : vector<8x1xf32>
    %508 = arith.mulf %503, %503 : vector<8x8xf32>
    %cst_183 = arith.constant dense<0.000000e+00> : vector<8xf32>
    %509 = vector.multi_reduction <add>, %508, %cst_183 [1] : vector<8x8xf32> to vector<8xf32>
    %510 = vector.shape_cast %509 : vector<8xf32> to vector<8x1xf32>
    %cst_184 = arith.constant 8.000000e+00 : f32
    %511 = vector.broadcast %cst_184 : f32 to vector<8x1xf32>
    %512 = arith.divf %510, %511 : vector<8x1xf32>
    %513 = arith.mulf %507, %507 : vector<8x1xf32>
    %514 = arith.subf %512, %513 : vector<8x1xf32>
    %cst_185 = arith.constant 0.000000e+00 : f32
    %515 = vector.broadcast %cst_185 : f32 to vector<8x1xf32>
    %516 = arith.maximumf %514, %515 : vector<8x1xf32>
    %517 = vector.broadcast %507 : vector<8x1xf32> to vector<8x8xf32>
    %518 = arith.subf %503, %517 : vector<8x8xf32>
    %cst_186 = arith.constant 9.99999974E-6 : f32
    %519 = vector.broadcast %cst_186 : f32 to vector<8x1xf32>
    %520 = arith.addf %516, %519 : vector<8x1xf32>
    %521 = math.rsqrt %520 : vector<8x1xf32>
    %522 = vector.broadcast %521 : vector<8x1xf32> to vector<8x8xf32>
    %523 = arith.mulf %518, %522 : vector<8x8xf32>
    %524 = vector.broadcast %12 : vector<1x8xf32> to vector<8x8xf32>
    %525 = arith.mulf %523, %524 : vector<8x8xf32>
    %526 = vector.broadcast %13 : vector<1x8xf32> to vector<8x8xf32>
    %527 = arith.addf %525, %526 : vector<8x8xf32>
    %528 = vector.broadcast %14 : vector<1x8xf32> to vector<8x8xf32>
    %529 = arith.mulf %528, %411 : vector<8x8xf32>
    %530 = vector.broadcast %15 : vector<1x8xf32> to vector<8x8xf32>
    %531 = arith.mulf %530, %527 : vector<8x8xf32>
    %532 = arith.addf %529, %531 : vector<8x8xf32>
    %533 = vector.broadcast %16 : vector<1x8xf32> to vector<8x8xf32>
    %534 = arith.addf %532, %533 : vector<8x8xf32>
    %c8_i32_187 = arith.constant 8 : i32
    %535 = arith.muli %c3_i32, %c8_i32_187 : i32
    %536 = tpu.assume_multiple %535, 8 : i32
    %537 = arith.index_cast %536 : i32 to index
    %c0_188 = arith.constant 0 : index
    %538 = vector.load %arg11[%537, %c0_188] : memref<48x8xf32, #tpu.memory_space<vmem>>, vector<8x8xf32>
    tpu.vector_store %arg11[%537, %c0_188], %534 {strides = array<i32>} : memref<48x8xf32, #tpu.memory_space<vmem>>, vector<8x8xf32>,
    %c4_i32 = arith.constant 4 : i32
    %cst_189 = arith.constant dense<0.000000e+00> : vector<8x32xf32>
    %539 = tpu.matmul %534, %3, %cst_189 {dimension_numbers = #tpu.dot_dimension_numbers<[1], [0], [0], [1], [0, 0, 1, 1], [], []>} : vector<8x8xf32>, vector<8x32xf32>, vector<8x32xf32> -> vector<8x32xf32>
    %540 = vector.broadcast %6 : vector<1x32xf32> to vector<8x32xf32>
    %541 = arith.addf %539, %540 : vector<8x32xf32>
    %cst_190 = arith.constant 5.000000e-01 : f32
    %542 = vector.broadcast %cst_190 : f32 to vector<8x32xf32>
    %543 = arith.mulf %542, %541 : vector<8x32xf32>
    %cst_191 = arith.constant 0.707106769 : f32
    %544 = vector.broadcast %cst_191 : f32 to vector<8x32xf32>
    %545 = arith.mulf %541, %544 : vector<8x32xf32>
    %546 = math.absf %545 : vector<8x32xf32>
    %cst_192 = arith.constant 0.327591091 : f32
    %547 = vector.broadcast %cst_192 : f32 to vector<8x32xf32>
    %548 = arith.mulf %547, %546 : vector<8x32xf32>
    %cst_193 = arith.constant 1.000000e+00 : f32
    %549 = vector.broadcast %cst_193 : f32 to vector<8x32xf32>
    %550 = arith.addf %549, %548 : vector<8x32xf32>
    %551 = tpu.reciprocal %550 {approx = true} : vector<8x32xf32> -> vector<8x32xf32>
    %cst_194 = arith.constant 1.06140542 : f32
    %552 = vector.broadcast %cst_194 : f32 to vector<8x32xf32>
    %553 = arith.mulf %552, %551 : vector<8x32xf32>
    %cst_195 = arith.constant -1.45315206 : f32
    %554 = vector.broadcast %cst_195 : f32 to vector<8x32xf32>
    %555 = arith.addf %553, %554 : vector<8x32xf32>
    %556 = arith.mulf %555, %551 : vector<8x32xf32>
    %cst_196 = arith.constant 1.42141378 : f32
    %557 = vector.broadcast %cst_196 : f32 to vector<8x32xf32>
    %558 = arith.addf %556, %557 : vector<8x32xf32>
    %559 = arith.mulf %558, %551 : vector<8x32xf32>
    %cst_197 = arith.constant -0.284496725 : f32
    %560 = vector.broadcast %cst_197 : f32 to vector<8x32xf32>
    %561 = arith.addf %559, %560 : vector<8x32xf32>
    %562 = arith.mulf %561, %551 : vector<8x32xf32>
    %cst_198 = arith.constant 0.254829586 : f32
    %563 = vector.broadcast %cst_198 : f32 to vector<8x32xf32>
    %564 = arith.addf %562, %563 : vector<8x32xf32>
    %565 = arith.mulf %564, %551 : vector<8x32xf32>
    %cst_199 = arith.constant 0.000000e+00 : f32
    %566 = vector.broadcast %cst_199 : f32 to vector<8x32xf32>
    %567 = arith.subf %566, %546 : vector<8x32xf32>
    %568 = arith.mulf %567, %546 : vector<8x32xf32>
    %569 = math.exp %568 : vector<8x32xf32>
    %570 = arith.mulf %565, %569 : vector<8x32xf32>
    %cst_200 = arith.constant 1.000000e+00 : f32
    %571 = vector.broadcast %cst_200 : f32 to vector<8x32xf32>
    %572 = arith.subf %571, %570 : vector<8x32xf32>
    %cst_201 = arith.constant 0.000000e+00 : f32
    %573 = vector.broadcast %cst_201 : f32 to vector<8x32xf32>
    %574 = arith.cmpf olt, %545, %573 : vector<8x32xf32>
    %cst_202 = arith.constant 0.000000e+00 : f32
    %575 = vector.broadcast %cst_202 : f32 to vector<8x32xf32>
    %576 = arith.subf %575, %572 : vector<8x32xf32>
    %577 = arith.select %574, %576, %572 : vector<8x32xi1>, vector<8x32xf32>
    %cst_203 = arith.constant 1.000000e+00 : f32
    %578 = vector.broadcast %cst_203 : f32 to vector<8x32xf32>
    %579 = arith.addf %578, %577 : vector<8x32xf32>
    %580 = arith.mulf %543, %579 : vector<8x32xf32>
    %cst_204 = arith.constant dense<0.000000e+00> : vector<8x32xf32>
    %581 = tpu.matmul %580, %4, %cst_204 {dimension_numbers = #tpu.dot_dimension_numbers<[1], [0], [0], [1], [0, 0, 1, 1], [], []>} : vector<8x32xf32>, vector<32x32xf32>, vector<8x32xf32> -> vector<8x32xf32>
    %582 = vector.broadcast %7 : vector<1x32xf32> to vector<8x32xf32>
    %583 = arith.addf %581, %582 : vector<8x32xf32>
    %cst_205 = arith.constant 5.000000e-01 : f32
    %584 = vector.broadcast %cst_205 : f32 to vector<8x32xf32>
    %585 = arith.mulf %584, %583 : vector<8x32xf32>
    %cst_206 = arith.constant 0.707106769 : f32
    %586 = vector.broadcast %cst_206 : f32 to vector<8x32xf32>
    %587 = arith.mulf %583, %586 : vector<8x32xf32>
    %588 = math.absf %587 : vector<8x32xf32>
    %cst_207 = arith.constant 0.327591091 : f32
    %589 = vector.broadcast %cst_207 : f32 to vector<8x32xf32>
    %590 = arith.mulf %589, %588 : vector<8x32xf32>
    %cst_208 = arith.constant 1.000000e+00 : f32
    %591 = vector.broadcast %cst_208 : f32 to vector<8x32xf32>
    %592 = arith.addf %591, %590 : vector<8x32xf32>
    %593 = tpu.reciprocal %592 {approx = true} : vector<8x32xf32> -> vector<8x32xf32>
    %cst_209 = arith.constant 1.06140542 : f32
    %594 = vector.broadcast %cst_209 : f32 to vector<8x32xf32>
    %595 = arith.mulf %594, %593 : vector<8x32xf32>
    %cst_210 = arith.constant -1.45315206 : f32
    %596 = vector.broadcast %cst_210 : f32 to vector<8x32xf32>
    %597 = arith.addf %595, %596 : vector<8x32xf32>
    %598 = arith.mulf %597, %593 : vector<8x32xf32>
    %cst_211 = arith.constant 1.42141378 : f32
    %599 = vector.broadcast %cst_211 : f32 to vector<8x32xf32>
    %600 = arith.addf %598, %599 : vector<8x32xf32>
    %601 = arith.mulf %600, %593 : vector<8x32xf32>
    %cst_212 = arith.constant -0.284496725 : f32
    %602 = vector.broadcast %cst_212 : f32 to vector<8x32xf32>
    %603 = arith.addf %601, %602 : vector<8x32xf32>
    %604 = arith.mulf %603, %593 : vector<8x32xf32>
    %cst_213 = arith.constant 0.254829586 : f32
    %605 = vector.broadcast %cst_213 : f32 to vector<8x32xf32>
    %606 = arith.addf %604, %605 : vector<8x32xf32>
    %607 = arith.mulf %606, %593 : vector<8x32xf32>
    %cst_214 = arith.constant 0.000000e+00 : f32
    %608 = vector.broadcast %cst_214 : f32 to vector<8x32xf32>
    %609 = arith.subf %608, %588 : vector<8x32xf32>
    %610 = arith.mulf %609, %588 : vector<8x32xf32>
    %611 = math.exp %610 : vector<8x32xf32>
    %612 = arith.mulf %607, %611 : vector<8x32xf32>
    %cst_215 = arith.constant 1.000000e+00 : f32
    %613 = vector.broadcast %cst_215 : f32 to vector<8x32xf32>
    %614 = arith.subf %613, %612 : vector<8x32xf32>
    %cst_216 = arith.constant 0.000000e+00 : f32
    %615 = vector.broadcast %cst_216 : f32 to vector<8x32xf32>
    %616 = arith.cmpf olt, %587, %615 : vector<8x32xf32>
    %cst_217 = arith.constant 0.000000e+00 : f32
    %617 = vector.broadcast %cst_217 : f32 to vector<8x32xf32>
    %618 = arith.subf %617, %614 : vector<8x32xf32>
    %619 = arith.select %616, %618, %614 : vector<8x32xi1>, vector<8x32xf32>
    %cst_218 = arith.constant 1.000000e+00 : f32
    %620 = vector.broadcast %cst_218 : f32 to vector<8x32xf32>
    %621 = arith.addf %620, %619 : vector<8x32xf32>
    %622 = arith.mulf %585, %621 : vector<8x32xf32>
    %cst_219 = arith.constant dense<0.000000e+00> : vector<8x8xf32>
    %623 = tpu.matmul %622, %5, %cst_219 {dimension_numbers = #tpu.dot_dimension_numbers<[1], [0], [0], [1], [0, 0, 1, 1], [], []>} : vector<8x32xf32>, vector<32x8xf32>, vector<8x8xf32> -> vector<8x8xf32>
    %624 = vector.broadcast %11 : vector<1x8xf32> to vector<8x8xf32>
    %625 = arith.addf %623, %624 : vector<8x8xf32>
    %626 = arith.addf %625, %534 : vector<8x8xf32>
    %cst_220 = arith.constant dense<0.000000e+00> : vector<8xf32>
    %627 = vector.multi_reduction <add>, %626, %cst_220 [1] : vector<8x8xf32> to vector<8xf32>
    %628 = vector.shape_cast %627 : vector<8xf32> to vector<8x1xf32>
    %cst_221 = arith.constant 8.000000e+00 : f32
    %629 = vector.broadcast %cst_221 : f32 to vector<8x1xf32>
    %630 = arith.divf %628, %629 : vector<8x1xf32>
    %631 = arith.mulf %626, %626 : vector<8x8xf32>
    %cst_222 = arith.constant dense<0.000000e+00> : vector<8xf32>
    %632 = vector.multi_reduction <add>, %631, %cst_222 [1] : vector<8x8xf32> to vector<8xf32>
    %633 = vector.shape_cast %632 : vector<8xf32> to vector<8x1xf32>
    %cst_223 = arith.constant 8.000000e+00 : f32
    %634 = vector.broadcast %cst_223 : f32 to vector<8x1xf32>
    %635 = arith.divf %633, %634 : vector<8x1xf32>
    %636 = arith.mulf %630, %630 : vector<8x1xf32>
    %637 = arith.subf %635, %636 : vector<8x1xf32>
    %cst_224 = arith.constant 0.000000e+00 : f32
    %638 = vector.broadcast %cst_224 : f32 to vector<8x1xf32>
    %639 = arith.maximumf %637, %638 : vector<8x1xf32>
    %640 = vector.broadcast %630 : vector<8x1xf32> to vector<8x8xf32>
    %641 = arith.subf %626, %640 : vector<8x8xf32>
    %cst_225 = arith.constant 9.99999974E-6 : f32
    %642 = vector.broadcast %cst_225 : f32 to vector<8x1xf32>
    %643 = arith.addf %639, %642 : vector<8x1xf32>
    %644 = math.rsqrt %643 : vector<8x1xf32>
    %645 = vector.broadcast %644 : vector<8x1xf32> to vector<8x8xf32>
    %646 = arith.mulf %641, %645 : vector<8x8xf32>
    %647 = vector.broadcast %12 : vector<1x8xf32> to vector<8x8xf32>
    %648 = arith.mulf %646, %647 : vector<8x8xf32>
    %649 = vector.broadcast %13 : vector<1x8xf32> to vector<8x8xf32>
    %650 = arith.addf %648, %649 : vector<8x8xf32>
    %651 = vector.broadcast %14 : vector<1x8xf32> to vector<8x8xf32>
    %652 = arith.mulf %651, %534 : vector<8x8xf32>
    %653 = vector.broadcast %15 : vector<1x8xf32> to vector<8x8xf32>
    %654 = arith.mulf %653, %650 : vector<8x8xf32>
    %655 = arith.addf %652, %654 : vector<8x8xf32>
    %656 = vector.broadcast %16 : vector<1x8xf32> to vector<8x8xf32>
    %657 = arith.addf %655, %656 : vector<8x8xf32>
    %c8_i32_226 = arith.constant 8 : i32
    %658 = arith.muli %c4_i32, %c8_i32_226 : i32
    %659 = tpu.assume_multiple %658, 8 : i32
    %660 = arith.index_cast %659 : i32 to index
    %c0_227 = arith.constant 0 : index
    %661 = vector.load %arg11[%660, %c0_227] : memref<48x8xf32, #tpu.memory_space<vmem>>, vector<8x8xf32>
    tpu.vector_store %arg11[%660, %c0_227], %657 {strides = array<i32>} : memref<48x8xf32, #tpu.memory_space<vmem>>, vector<8x8xf32>,
    %c5_i32 = arith.constant 5 : i32
    %cst_228 = arith.constant dense<0.000000e+00> : vector<8x32xf32>
    %662 = tpu.matmul %657, %3, %cst_228 {dimension_numbers = #tpu.dot_dimension_numbers<[1], [0], [0], [1], [0, 0, 1, 1], [], []>} : vector<8x8xf32>, vector<8x32xf32>, vector<8x32xf32> -> vector<8x32xf32>
    %663 = vector.broadcast %6 : vector<1x32xf32> to vector<8x32xf32>
    %664 = arith.addf %662, %663 : vector<8x32xf32>
    %cst_229 = arith.constant 5.000000e-01 : f32
    %665 = vector.broadcast %cst_229 : f32 to vector<8x32xf32>
    %666 = arith.mulf %665, %664 : vector<8x32xf32>
    %cst_230 = arith.constant 0.707106769 : f32
    %667 = vector.broadcast %cst_230 : f32 to vector<8x32xf32>
    %668 = arith.mulf %664, %667 : vector<8x32xf32>
    %669 = math.absf %668 : vector<8x32xf32>
    %cst_231 = arith.constant 0.327591091 : f32
    %670 = vector.broadcast %cst_231 : f32 to vector<8x32xf32>
    %671 = arith.mulf %670, %669 : vector<8x32xf32>
    %cst_232 = arith.constant 1.000000e+00 : f32
    %672 = vector.broadcast %cst_232 : f32 to vector<8x32xf32>
    %673 = arith.addf %672, %671 : vector<8x32xf32>
    %674 = tpu.reciprocal %673 {approx = true} : vector<8x32xf32> -> vector<8x32xf32>
    %cst_233 = arith.constant 1.06140542 : f32
    %675 = vector.broadcast %cst_233 : f32 to vector<8x32xf32>
    %676 = arith.mulf %675, %674 : vector<8x32xf32>
    %cst_234 = arith.constant -1.45315206 : f32
    %677 = vector.broadcast %cst_234 : f32 to vector<8x32xf32>
    %678 = arith.addf %676, %677 : vector<8x32xf32>
    %679 = arith.mulf %678, %674 : vector<8x32xf32>
    %cst_235 = arith.constant 1.42141378 : f32
    %680 = vector.broadcast %cst_235 : f32 to vector<8x32xf32>
    %681 = arith.addf %679, %680 : vector<8x32xf32>
    %682 = arith.mulf %681, %674 : vector<8x32xf32>
    %cst_236 = arith.constant -0.284496725 : f32
    %683 = vector.broadcast %cst_236 : f32 to vector<8x32xf32>
    %684 = arith.addf %682, %683 : vector<8x32xf32>
    %685 = arith.mulf %684, %674 : vector<8x32xf32>
    %cst_237 = arith.constant 0.254829586 : f32
    %686 = vector.broadcast %cst_237 : f32 to vector<8x32xf32>
    %687 = arith.addf %685, %686 : vector<8x32xf32>
    %688 = arith.mulf %687, %674 : vector<8x32xf32>
    %cst_238 = arith.constant 0.000000e+00 : f32
    %689 = vector.broadcast %cst_238 : f32 to vector<8x32xf32>
    %690 = arith.subf %689, %669 : vector<8x32xf32>
    %691 = arith.mulf %690, %669 : vector<8x32xf32>
    %692 = math.exp %691 : vector<8x32xf32>
    %693 = arith.mulf %688, %692 : vector<8x32xf32>
    %cst_239 = arith.constant 1.000000e+00 : f32
    %694 = vector.broadcast %cst_239 : f32 to vector<8x32xf32>
    %695 = arith.subf %694, %693 : vector<8x32xf32>
    %cst_240 = arith.constant 0.000000e+00 : f32
    %696 = vector.broadcast %cst_240 : f32 to vector<8x32xf32>
    %697 = arith.cmpf olt, %668, %696 : vector<8x32xf32>
    %cst_241 = arith.constant 0.000000e+00 : f32
    %698 = vector.broadcast %cst_241 : f32 to vector<8x32xf32>
    %699 = arith.subf %698, %695 : vector<8x32xf32>
    %700 = arith.select %697, %699, %695 : vector<8x32xi1>, vector<8x32xf32>
    %cst_242 = arith.constant 1.000000e+00 : f32
    %701 = vector.broadcast %cst_242 : f32 to vector<8x32xf32>
    %702 = arith.addf %701, %700 : vector<8x32xf32>
    %703 = arith.mulf %666, %702 : vector<8x32xf32>
    %cst_243 = arith.constant dense<0.000000e+00> : vector<8x32xf32>
    %704 = tpu.matmul %703, %4, %cst_243 {dimension_numbers = #tpu.dot_dimension_numbers<[1], [0], [0], [1], [0, 0, 1, 1], [], []>} : vector<8x32xf32>, vector<32x32xf32>, vector<8x32xf32> -> vector<8x32xf32>
    %705 = vector.broadcast %7 : vector<1x32xf32> to vector<8x32xf32>
    %706 = arith.addf %704, %705 : vector<8x32xf32>
    %cst_244 = arith.constant 5.000000e-01 : f32
    %707 = vector.broadcast %cst_244 : f32 to vector<8x32xf32>
    %708 = arith.mulf %707, %706 : vector<8x32xf32>
    %cst_245 = arith.constant 0.707106769 : f32
    %709 = vector.broadcast %cst_245 : f32 to vector<8x32xf32>
    %710 = arith.mulf %706, %709 : vector<8x32xf32>
    %711 = math.absf %710 : vector<8x32xf32>
    %cst_246 = arith.constant 0.327591091 : f32
    %712 = vector.broadcast %cst_246 : f32 to vector<8x32xf32>
    %713 = arith.mulf %712, %711 : vector<8x32xf32>
    %cst_247 = arith.constant 1.000000e+00 : f32
    %714 = vector.broadcast %cst_247 : f32 to vector<8x32xf32>
    %715 = arith.addf %714, %713 : vector<8x32xf32>
    %716 = tpu.reciprocal %715 {approx = true} : vector<8x32xf32> -> vector<8x32xf32>
    %cst_248 = arith.constant 1.06140542 : f32
    %717 = vector.broadcast %cst_248 : f32 to vector<8x32xf32>
    %718 = arith.mulf %717, %716 : vector<8x32xf32>
    %cst_249 = arith.constant -1.45315206 : f32
    %719 = vector.broadcast %cst_249 : f32 to vector<8x32xf32>
    %720 = arith.addf %718, %719 : vector<8x32xf32>
    %721 = arith.mulf %720, %716 : vector<8x32xf32>
    %cst_250 = arith.constant 1.42141378 : f32
    %722 = vector.broadcast %cst_250 : f32 to vector<8x32xf32>
    %723 = arith.addf %721, %722 : vector<8x32xf32>
    %724 = arith.mulf %723, %716 : vector<8x32xf32>
    %cst_251 = arith.constant -0.284496725 : f32
    %725 = vector.broadcast %cst_251 : f32 to vector<8x32xf32>
    %726 = arith.addf %724, %725 : vector<8x32xf32>
    %727 = arith.mulf %726, %716 : vector<8x32xf32>
    %cst_252 = arith.constant 0.254829586 : f32
    %728 = vector.broadcast %cst_252 : f32 to vector<8x32xf32>
    %729 = arith.addf %727, %728 : vector<8x32xf32>
    %730 = arith.mulf %729, %716 : vector<8x32xf32>
    %cst_253 = arith.constant 0.000000e+00 : f32
    %731 = vector.broadcast %cst_253 : f32 to vector<8x32xf32>
    %732 = arith.subf %731, %711 : vector<8x32xf32>
    %733 = arith.mulf %732, %711 : vector<8x32xf32>
    %734 = math.exp %733 : vector<8x32xf32>
    %735 = arith.mulf %730, %734 : vector<8x32xf32>
    %cst_254 = arith.constant 1.000000e+00 : f32
    %736 = vector.broadcast %cst_254 : f32 to vector<8x32xf32>
    %737 = arith.subf %736, %735 : vector<8x32xf32>
    %cst_255 = arith.constant 0.000000e+00 : f32
    %738 = vector.broadcast %cst_255 : f32 to vector<8x32xf32>
    %739 = arith.cmpf olt, %710, %738 : vector<8x32xf32>
    %cst_256 = arith.constant 0.000000e+00 : f32
    %740 = vector.broadcast %cst_256 : f32 to vector<8x32xf32>
    %741 = arith.subf %740, %737 : vector<8x32xf32>
    %742 = arith.select %739, %741, %737 : vector<8x32xi1>, vector<8x32xf32>
    %cst_257 = arith.constant 1.000000e+00 : f32
    %743 = vector.broadcast %cst_257 : f32 to vector<8x32xf32>
    %744 = arith.addf %743, %742 : vector<8x32xf32>
    %745 = arith.mulf %708, %744 : vector<8x32xf32>
    %cst_258 = arith.constant dense<0.000000e+00> : vector<8x8xf32>
    %746 = tpu.matmul %745, %5, %cst_258 {dimension_numbers = #tpu.dot_dimension_numbers<[1], [0], [0], [1], [0, 0, 1, 1], [], []>} : vector<8x32xf32>, vector<32x8xf32>, vector<8x8xf32> -> vector<8x8xf32>
    %747 = vector.broadcast %11 : vector<1x8xf32> to vector<8x8xf32>
    %748 = arith.addf %746, %747 : vector<8x8xf32>
    %749 = arith.addf %748, %657 : vector<8x8xf32>
    %cst_259 = arith.constant dense<0.000000e+00> : vector<8xf32>
    %750 = vector.multi_reduction <add>, %749, %cst_259 [1] : vector<8x8xf32> to vector<8xf32>
    %751 = vector.shape_cast %750 : vector<8xf32> to vector<8x1xf32>
    %cst_260 = arith.constant 8.000000e+00 : f32
    %752 = vector.broadcast %cst_260 : f32 to vector<8x1xf32>
    %753 = arith.divf %751, %752 : vector<8x1xf32>
    %754 = arith.mulf %749, %749 : vector<8x8xf32>
    %cst_261 = arith.constant dense<0.000000e+00> : vector<8xf32>
    %755 = vector.multi_reduction <add>, %754, %cst_261 [1] : vector<8x8xf32> to vector<8xf32>
    %756 = vector.shape_cast %755 : vector<8xf32> to vector<8x1xf32>
    %cst_262 = arith.constant 8.000000e+00 : f32
    %757 = vector.broadcast %cst_262 : f32 to vector<8x1xf32>
    %758 = arith.divf %756, %757 : vector<8x1xf32>
    %759 = arith.mulf %753, %753 : vector<8x1xf32>
    %760 = arith.subf %758, %759 : vector<8x1xf32>
    %cst_263 = arith.constant 0.000000e+00 : f32
    %761 = vector.broadcast %cst_263 : f32 to vector<8x1xf32>
    %762 = arith.maximumf %760, %761 : vector<8x1xf32>
    %763 = vector.broadcast %753 : vector<8x1xf32> to vector<8x8xf32>
    %764 = arith.subf %749, %763 : vector<8x8xf32>
    %cst_264 = arith.constant 9.99999974E-6 : f32
    %765 = vector.broadcast %cst_264 : f32 to vector<8x1xf32>
    %766 = arith.addf %762, %765 : vector<8x1xf32>
    %767 = math.rsqrt %766 : vector<8x1xf32>
    %768 = vector.broadcast %767 : vector<8x1xf32> to vector<8x8xf32>
    %769 = arith.mulf %764, %768 : vector<8x8xf32>
    %770 = vector.broadcast %12 : vector<1x8xf32> to vector<8x8xf32>
    %771 = arith.mulf %769, %770 : vector<8x8xf32>
    %772 = vector.broadcast %13 : vector<1x8xf32> to vector<8x8xf32>
    %773 = arith.addf %771, %772 : vector<8x8xf32>
    %774 = vector.broadcast %14 : vector<1x8xf32> to vector<8x8xf32>
    %775 = arith.mulf %774, %657 : vector<8x8xf32>
    %776 = vector.broadcast %15 : vector<1x8xf32> to vector<8x8xf32>
    %777 = arith.mulf %776, %773 : vector<8x8xf32>
    %778 = arith.addf %775, %777 : vector<8x8xf32>
    %779 = vector.broadcast %16 : vector<1x8xf32> to vector<8x8xf32>
    %780 = arith.addf %778, %779 : vector<8x8xf32>
    %c8_i32_265 = arith.constant 8 : i32
    %781 = arith.muli %c5_i32, %c8_i32_265 : i32
    %782 = tpu.assume_multiple %781, 8 : i32
    %783 = arith.index_cast %782 : i32 to index
    %c0_266 = arith.constant 0 : index
    %784 = vector.load %arg11[%783, %c0_266] : memref<48x8xf32, #tpu.memory_space<vmem>>, vector<8x8xf32>
    tpu.vector_store %arg11[%783, %c0_266], %780 {strides = array<i32>} : memref<48x8xf32, #tpu.memory_space<vmem>>, vector<8x8xf32>,
    %c6_i32 = arith.constant 6 : i32
    %c0_267 = arith.constant 0 : index
    %c0_268 = arith.constant 0 : index
    %785 = vector.load %arg11[%c0_267, %c0_268] : memref<48x8xf32, #tpu.memory_space<vmem>>, vector<48x8xf32>
    %cst_269 = arith.constant dense<0.000000e+00> : vector<48x16xf32>
    %786 = tpu.matmul %785, %0, %cst_269 {dimension_numbers = #tpu.dot_dimension_numbers<[1], [0], [0], [1], [0, 0, 1, 1], [], []>} : vector<48x8xf32>, vector<8x16xf32>, vector<48x16xf32> -> vector<48x16xf32>
    %c0_270 = arith.constant 0 : index
    %c0_271 = arith.constant 0 : index
    %787 = vector.load %arg0[%c0_270, %c0_271] : memref<48x2xf32, #tpu.memory_space<vmem>>, vector<48x2xf32>
    %788 = vector.extract_strided_slice %787 {offsets = [0, 0], sizes = [48, 1], strides = [1, 1]} : vector<48x2xf32> to vector<48x1xf32>
    %cst_272 = arith.constant 1.000000e+00 : f32
    %789 = vector.broadcast %cst_272 : f32 to vector<1x16xf32>
    %790 = arith.subf %789, %1 : vector<1x16xf32>
    %791 = vector.broadcast %788 : vector<48x1xf32> to vector<48x16xf32>
    %792 = vector.broadcast %790 : vector<1x16xf32> to vector<48x16xf32>
    %793 = arith.mulf %791, %792 : vector<48x16xf32>
    %794 = vector.extract_strided_slice %787 {offsets = [0, 1], sizes = [48, 1], strides = [1, 1]} : vector<48x2xf32> to vector<48x1xf32>
    %795 = vector.broadcast %794 : vector<48x1xf32> to vector<48x16xf32>
    %796 = vector.broadcast %1 : vector<1x16xf32> to vector<48x16xf32>
    %797 = arith.mulf %795, %796 : vector<48x16xf32>
    %798 = arith.addf %793, %797 : vector<48x16xf32>
    %799 = arith.addf %798, %786 : vector<48x16xf32>
    %c0_273 = arith.constant 0 : index
    %c0_274 = arith.constant 0 : index
    %800 = vector.load %arg10[%c0_273, %c0_274] : memref<48x16xf32, #tpu.memory_space<vmem>>, vector<48x16xf32>
    tpu.vector_store %arg10[%c0_273, %c0_274], %799 {strides = array<i32>} : memref<48x16xf32, #tpu.memory_space<vmem>>, vector<48x16xf32>,
    return
  }
}

</mosaic_0001>

<bundles_post_ra>
// kernel: tpu_custom_call.1
= control target key start
LH: loop header
LB: loop body
LE: loop exit
PB: predicated region body
PF: predicated region fallthrough
CT: control target
= control target key end

     0   :  { %vm60_vm0 = vcmask 64512   ;;  %v1339_v9 = vmov 8.0   ;;  %vm172_vm6 = vcmask 261120   ;;  %s1794_s4 = inlined_call_operand.vmem [shape: f32[8,8], index: 4, kind: input, shape index: {}]   ;;  %s1795_s1 = inlined_call_operand.vmem [shape: f32[8,8], index: 1, kind: input, shape index: {}]   ;;  %s1796_s8 = inlined_call_operand.vmem [shape: f32[9,8], index: 8, kind: input, shape index: {}]   ;;  %s1797_s9 = inlined_call_operand.vmem [shape: f32[2,32], index: 9, kind: input, shape index: {}]   ;;  %s1798_s5 = inlined_call_operand.vmem [shape: f32[8,32], index: 5, kind: input, shape index: {}]   ;;  %s1799_s6 = inlined_call_operand.vmem [shape: f32[32,32], index: 6, kind: input, shape index: {}]   ;;  %s1800_s7 = inlined_call_operand.vmem [shape: f32[32,8], index: 7, kind: input, shape index: {}]   ;;  %s1801_s2 = inlined_call_operand.vmem [shape: f32[8,16], index: 2, kind: input, shape index: {}]   ;;  %s1802_s0 = inlined_call_operand.vmem [shape: f32[48,2], index: 0, kind: input, shape index: {}]   ;;  %s1803_s3 = inlined_call_operand.vmem [shape: f32[1,16], index: 3, kind: input, shape index: {}]   ;;  %s1804_s10 = inlined_call_operand.vmem [shape: f32[48,16], index: 10, kind: output, shape index: {}]  }
   0x1   :  { %v37_v0 = vld [vmem:[%s1794_s4] sm:$0xff]  ;;  %1267 = vrcp.f32 %v1339_v9  ;;  %v1439_v44 = vld [vmem:[%s1799_s6 + $0x18] sm:$0xff]  ;;  %v1446_v46 = vld [vmem:[%s1799_s6 + $0x10] sm:$0xff] }
   0x2   :  { %v58_v1 = vld [vmem:[%s1795_s1] sm:$0xff]  ;;  %79 = vmatpush.msra.mxu0 %v37_v0  ;;  %348 = vmatpush.msra.mxu1 %v1439_v44  ;;  %v1454_v47 = vld [vmem:[%s1799_s6 + $0x8] sm:$0xff] }
   0x3   :  { %1220 = vmatmul.msk.f32.vlgmr.msra.gmra.mxu0 %vm60_vm0, %v58_v1  ;;  %v1255_v2 = vld [vmem:[%s1796_s8] ss:$0 sm:$0xff]  ;;  %v1256_v32 = vld [vmem:[%s1796_s8 + $0x1] ss:$0 sm:$0xff]  ;;  %v1257_v35 = vld [vmem:[%s1796_s8 + $0x2] ss:$0 sm:$0xff] }
   0x4   :  { %v1412_v16 = vld [vmem:[%s1798_s5] sm:$0xff]  ;;  %349 = vmatpush.msra.mxu1 %v1446_v46 }
   0x5   :  { %140 = vmatpush.msra.mxu2 %v1412_v16  ;;  %457 = vmatpush.msra.mxu3 %v1412_v16  ;;  %v1433_v38 = vld [vmem:[%s1797_s9] ss:$0 sm:$0xff] }
   0x6   :  { %350 = vmatpush.msra.mxu1 %v1454_v47  ;;  %v1462_v48 = vld [vmem:[%s1799_s6] sm:$0xff] }
   0x7   :  { %v1268_v10 = vpop.eup %1267  ;;  %188 = vmatpush.msrb.mxu2 %v1439_v44  ;;  %658 = vmatpush.msrb.mxu3 %v1439_v44 }
   0x8   :  { %v89_v11 = vmul.f32 8.0, %v1268_v10  ;;  %vm93_vm1 = vweird.f32 %v1268_v10  ;;  %351 = vmatpush.msra.mxu1 %v1462_v48 }
   0x9   :  { %189 = vmatpush.msrb.mxu2 %v1446_v46  ;;  %659 = vmatpush.msrb.mxu3 %v1446_v46 }
   0xa   :  { %v90_v12 = vsub.f32 1.0, %v89_v11 }
   0xb   :  { %190 = vmatpush.msrb.mxu2 %v1454_v47  ;;  %660 = vmatpush.msrb.mxu3 %v1454_v47 }
   0xc   :  { %v91_v13 = vmul.f32 %v1268_v10, %v90_v12  ;;  %v1478_v12 = vld [vmem:[%s1800_s7 + $0x18] sm:$0xff] }
   0xd   :  { %191 = vmatpush.msrb.mxu2 %v1462_v48  ;;  %661 = vmatpush.msrb.mxu3 %v1462_v48 }
   0xe   :  { %v92_v14 = vadd.f32 %v1268_v10, %v91_v13  ;;  %238 = vmatpush.msrb.mxu0 %v1478_v12  ;;  %552 = vmatpush.msrb.mxu1 %v1478_v12 }
  0x10   :  { %v1416_v17 = vsel %vm93_vm1, %v1268_v10, %v92_v14  ;;  %v1485_v14 = vld [vmem:[%s1800_s7 + $0x10] sm:$0xff] }
  0x11   :  { %239 = vmatpush.msrb.mxu0 %v1485_v14  ;;  %553 = vmatpush.msrb.mxu1 %v1485_v14 }
  0x80   :  { %v81_v3 = vpop.f32.mrf.mxu0 }
  0x81   :  { %v82_v4 = vadd.f32 %v1255_v2, %v81_v3 }
  0x83   :  { %v84_v5 = vmax.f32 %v82_v4, 0.0 }
  0x85   :  { %v85_v6 = vsel %vm60_vm0, %v84_v5, 0.0  ;;  %v96_v7 = vmul.f32 %v84_v5, %v84_v5 }
  0x86   :  { %86 = vadd.xlane.f32.xlu0 %v85_v6  ;;  %v1472_v6 = vld [vmem:[%s1797_s9 + $0x1] ss:$0 sm:$0xff] }
  0x87   :  { %v97_v8 = vsel %vm60_vm0, %v96_v7, 0.0 }
  0x8e   :  { %98 = vadd.xlane.f32.xlu0 %v97_v8 }
  0xf9   :  { %v87_v15 = vpop.xlane.xlu0 %86 }
  0xfa   :  { %v95_v18 = vmul.f32 %v1416_v17, %v87_v15  ;;  %v1493_v15 = vld [vmem:[%s1800_s7 + $0x8] sm:$0xff] }
  0xfb   :  { %240 = vmatpush.msrb.mxu0 %v1493_v15  ;;  %554 = vmatpush.msrb.mxu1 %v1493_v15 }
  0xfc   :  { %v101_v20 = vmul.f32 %v95_v18, %v95_v18  ;;  %v104_v31 = vsub.f32 %v84_v5, %v95_v18  ;;  %v1501_v18 = vld [vmem:[%s1800_s7] sm:$0xff] }
  0xfd   :  { %241 = vmatpush.msrb.mxu0 %v1501_v18  ;;  %555 = vmatpush.msrb.mxu1 %v1501_v18 }
  0xff   :  { %302 = vmatpush.msra.mxu0 %v1412_v16 }
 0x101   :  { %v99_v19 = vpop.xlane.xlu0 %98 }
 0x102   :  { %v100_v21 = vmul.f32 %v99_v19, %v1416_v17 }
 0x104   :  { %v102_v22 = vsub.f32 %v100_v21, %v101_v20 }
 0x106   :  { %v103_v23 = vmax.f32 %v102_v22, 0.0 }
 0x108   :  { %v105_v24 = vadd.f32 1e-05, %v103_v23 }
 0x10a   :  { %1269 = vrsqrt.f32 %v105_v24  ;;  %vm112_vm3 = vweird.f32 %v105_v24 }
 0x110   :  { %v1270_v25 = vpop.eup %1269 }
 0x111   :  { %v107_v26 = vmul.f32 %v1270_v25, %v105_v24  ;;  %vm113_vm2 = vweird.f32 %v1270_v25 }
 0x112   :  { %vm114_vm4 = vmor %vm112_vm3, %vm113_vm2 }
 0x113   :  { %v108_v27 = vmul.f32 %v1270_v25, %v107_v26 }
 0x115   :  { %v109_v28 = vmul.f32 0.5, %v108_v27 }
 0x117   :  { %v110_v29 = vsub.f32 1.5, %v109_v28 }
 0x119   :  { %v111_v30 = vmul.f32 %v1270_v25, %v110_v29 }
 0x11b   :  { %v115_v33 = vsel %vm114_vm4, %v1270_v25, %v111_v30 }
 0x11c   :  { %v116_v34 = vmul.f32 %v115_v33, %v104_v31 }
 0x11e   :  { %v118_v36 = vmul.f32 %v1256_v32, %v116_v34 }
 0x120   :  { %v1426_v37 = vadd.f32 %v1257_v35, %v118_v36 }
 0x122   :  { %1221 = vmatmul.msk.f32.vlgmr.msra.gmra.mxu2 %vm60_vm0, %v1426_v37 }
 0x123   :  { %397 = vmatpush.msra.mxu2 %v1478_v12 }
 0x125   :  { %398 = vmatpush.msra.mxu2 %v1485_v14 }
 0x127   :  { %399 = vmatpush.msra.mxu2 %v1493_v15 }
 0x129   :  { %400 = vmatpush.msra.mxu2 %v1501_v18 }
 0x1a5   :  { %v142_v39 = vpop.f32.mrf.mxu2 }
 0x1a6   :  { %v143_v40 = vadd.f32 %v1433_v38, %v142_v39 }
 0x1a8   :  { %v146_v41 = vmul.f32 0.70710677, %v143_v40  ;;  %v145_v3 = vmul.f32 0.5, %v143_v40 }
 0x1aa   :  { %v147_v42 = vand.u32 2147483647, %v146_v41  ;;  %vm166_vm5 = vcmp.lt.f32.partialorder %v146_v41, 0.0 }
 0x1ac   :  { %v148_v43 = vmul.f32 0.3275911, %v147_v42  ;;  %v160_v50 = vsub.f32 0.0, %v147_v42 }
 0x1ae   :  { %v149_v45 = vadd.f32 1.0, %v148_v43  ;;  %v161_v53 = vmul.f32 %v160_v50, %v147_v42  ;;  %v1517_v42 = vld [vmem:[%s1796_s8 + $0x3] ss:$0 sm:$0xff] }
 0x1b0   :  { %1271 = vrcp.f32 %v149_v45  ;;  %v162_v56 = vmul.f32 1.442695, %v161_v53 }
 0x1b2   :  { %1273 = vpow2.f32 %v162_v56 }
 0x1b6   :  { %v1272_v49 = vpop.eup %1271 }
 0x1b7   :  { %v151_v51 = vmul.f32 1.0614054, %v1272_v49 }
 0x1b8   :  { %v1274_v62 = vpop.eup %1273 }
 0x1b9   :  { %v152_v52 = vadd.f32 -1.4531521, %v151_v51 }
 0x1bb   :  { %v153_v54 = vmul.f32 %v1272_v49, %v152_v52 }
 0x1bd   :  { %v154_v55 = vadd.f32 1.4214138, %v153_v54 }
 0x1bf   :  { %v155_v57 = vmul.f32 %v1272_v49, %v154_v55 }
 0x1c1   :  { %v156_v58 = vadd.f32 -0.28449672, %v155_v57 }
 0x1c3   :  { %v157_v59 = vmul.f32 %v1272_v49, %v156_v58 }
 0x1c5   :  { %v158_v60 = vadd.f32 0.2548296, %v157_v59 }
 0x1c7   :  { %v159_v61 = vmul.f32 %v1272_v49, %v158_v60 }
 0x1c9   :  { %v164_v63 = vmul.f32 %v1274_v62, %v159_v61 }
 0x1cb   :  { %v165_v0 = vsub.f32 1.0, %v164_v63 }
 0x1cd   :  { %v167_v1 = vsub.f32 0.0, %v165_v0 }
 0x1cf   :  { %v168_v2 = vsel %vm166_vm5, %v167_v1, %v165_v0 }
 0x1d0   :  { %v169_v4 = vadd.f32 1.0, %v168_v2 }
 0x1d2   :  { %v170_v5 = vmul.f32 %v169_v4, %v145_v3  ;;  %v1528_v4 = vld [vmem:[%s1796_s8 + $0x4] ss:$0 sm:$0xff] }
 0x1d4   :  { %1222 = vmatmul.msk.f32.vlgmr.msrb.gmra.mxu2 %vm172_vm6, %v170_v5 }
 0x1d5   :  { %612 = vmatpush.msrb.mxu2 %v1412_v16 }
 0x257   :  { %v193_v7 = vpop.f32.mrf.mxu2 }
 0x258   :  { %v194_v8 = vadd.f32 %v1472_v6, %v193_v7  ;;  %v1533_v7 = vld [vmem:[%s1796_s8 + $0x5] ss:$0 sm:$0xff] }
 0x25a   :  { %v197_v9 = vmul.f32 0.70710677, %v194_v8  ;;  %v196_v39 = vmul.f32 0.5, %v194_v8 }
 0x25c   :  { %v198_v10 = vand.u32 2147483647, %v197_v9  ;;  %vm217_vm7 = vcmp.lt.f32.partialorder %v197_v9, 0.0  ;;  %v1538_v9 = vld [vmem:[%s1796_s8 + $0x6] ss:$0 sm:$0xff] }
 0x25e   :  { %v199_v11 = vmul.f32 0.3275911, %v198_v10  ;;  %v211_v20 = vsub.f32 0.0, %v198_v10 }
 0x260   :  { %v200_v13 = vadd.f32 1.0, %v199_v11  ;;  %v212_v23 = vmul.f32 %v211_v20, %v198_v10  ;;  %v1544_v11 = vld [vmem:[%s1796_s8 + $0x7] ss:$0 sm:$0xff] }
 0x262   :  { %1275 = vrcp.f32 %v200_v13  ;;  %v213_v26 = vmul.f32 1.442695, %v212_v23 }
 0x264   :  { %1277 = vpow2.f32 %v213_v26 }
 0x268   :  { %v1276_v19 = vpop.eup %1275 }
 0x269   :  { %v202_v21 = vmul.f32 1.0614054, %v1276_v19 }
 0x26a   :  { %v1278_v32 = vpop.eup %1277 }
 0x26b   :  { %v203_v22 = vadd.f32 -1.4531521, %v202_v21  ;;  %v1553_v21 = vld [vmem:[%s1796_s8 + $0x8] ss:$0 sm:$0xff] }
 0x26d   :  { %v204_v24 = vmul.f32 %v1276_v19, %v203_v22 }
 0x26f   :  { %v205_v25 = vadd.f32 1.4214138, %v204_v24 }
 0x271   :  { %v206_v27 = vmul.f32 %v1276_v19, %v205_v25 }
 0x273   :  { %v207_v28 = vadd.f32 -0.28449672, %v206_v27 }
 0x275   :  { %v208_v29 = vmul.f32 %v1276_v19, %v207_v28 }
 0x277   :  { %v209_v30 = vadd.f32 0.2548296, %v208_v29 }
 0x279   :  { %v210_v31 = vmul.f32 %v1276_v19, %v209_v30  ;;  %v277_v19 = vmul.f32 %v1538_v9, %v1426_v37 }
 0x27b   :  { %v215_v33 = vmul.f32 %v1278_v32, %v210_v31 }
 0x27d   :  { %v216_v34 = vsub.f32 1.0, %v215_v33 }
 0x27f   :  { %v218_v35 = vsub.f32 0.0, %v216_v34 }
 0x281   :  { %v219_v36 = vsel %vm217_vm7, %v218_v35, %v216_v34 }
 0x282   :  { %v220_v40 = vadd.f32 1.0, %v219_v36 }
 0x284   :  { %v221_v41 = vmul.f32 %v220_v40, %v196_v39 }
 0x286   :  { %1223 = vmatmul.msk.f32.vlgmr.msrb.gmra.mxu0 %vm172_vm6, %v221_v41 }
 0x287   :  { %503 = vmatpush.msrb.mxu0 %v1439_v44 }
 0x289   :  { %504 = vmatpush.msrb.mxu0 %v1446_v46 }
 0x28b   :  { %505 = vmatpush.msrb.mxu0 %v1454_v47 }
 0x28d   :  { %506 = vmatpush.msrb.mxu0 %v1462_v48 }
 0x303   :  { %v243_v43 = vpop.f32.mrf.mxu0 }
 0x304   :  { %v244_v45 = vadd.f32 %v1517_v42, %v243_v43 }
 0x306   :  { %v246_v49 = vadd.f32 %v244_v45, %v1426_v37 }
 0x308   :  { %v247_v50 = vsel %vm60_vm0, %v246_v49, 0.0  ;;  %v251_v51 = vmul.f32 %v246_v49, %v246_v49 }
 0x309   :  { %248 = vadd.xlane.f32.xlu1 %v247_v50 }
 0x30a   :  { %v252_v52 = vsel %vm60_vm0, %v251_v51, 0.0 }
 0x311   :  { %253 = vadd.xlane.f32.xlu1 %v252_v52 }
 0x37c   :  { %v249_v53 = vpop.xlane.xlu1 %248 }
 0x37d   :  { %v250_v54 = vmul.f32 %v249_v53, %v1416_v17 }
 0x37f   :  { %v256_v56 = vmul.f32 %v250_v54, %v250_v54  ;;  %v259_v3 = vsub.f32 %v246_v49, %v250_v54 }
 0x384   :  { %v254_v55 = vpop.xlane.xlu1 %253 }
 0x385   :  { %v255_v57 = vmul.f32 %v254_v55, %v1416_v17 }
 0x387   :  { %v257_v58 = vsub.f32 %v255_v57, %v256_v56 }
 0x389   :  { %v258_v59 = vmax.f32 %v257_v58, 0.0 }
 0x38b   :  { %v260_v60 = vadd.f32 1e-05, %v258_v59 }
 0x38d   :  { %1279 = vrsqrt.f32 %v260_v60  ;;  %vm267_vm9 = vweird.f32 %v260_v60 }
 0x393   :  { %v1280_v61 = vpop.eup %1279 }
 0x394   :  { %v262_v62 = vmul.f32 %v1280_v61, %v260_v60  ;;  %vm268_vm8 = vweird.f32 %v1280_v61 }
 0x395   :  { %vm269_vm10 = vmor %vm267_vm9, %vm268_vm8 }
 0x396   :  { %v263_v63 = vmul.f32 %v1280_v61, %v262_v62 }
 0x398   :  { %v264_v0 = vmul.f32 0.5, %v263_v63 }
 0x39a   :  { %v265_v1 = vsub.f32 1.5, %v264_v0 }
 0x39c   :  { %v266_v2 = vmul.f32 %v1280_v61, %v265_v1 }
 0x39e   :  { %v270_v5 = vsel %vm269_vm10, %v1280_v61, %v266_v2 }
 0x39f   :  { %v271_v8 = vmul.f32 %v270_v5, %v259_v3 }
 0x3a1   :  { %v273_v10 = vmul.f32 %v1528_v4, %v271_v8 }
 0x3a3   :  { %v275_v13 = vadd.f32 %v1533_v7, %v273_v10 }
 0x3a5   :  { %v279_v20 = vmul.f32 %v1544_v11, %v275_v13 }
 0x3a7   :  { %v280_v22 = vadd.f32 %v279_v20, %v277_v19 }
 0x3a9   :  { %v1556_v23 = vadd.f32 %v1553_v21, %v280_v22 }
 0x3ab   :  { %283 = vst.msk [vmem:[#allocation2] sm:$0xff] %vm60_vm0, %v1556_v23  ;;  %1224 = vmatmul.msk.f32.vlgmr.msra.gmra.mxu0 %vm60_vm0, %v1556_v23 }
 0x3ac   :  { %707 = vmatpush.msra.mxu0 %v1478_v12 }
 0x3ae   :  { %708 = vmatpush.msra.mxu0 %v1485_v14 }
 0x3b0   :  { %709 = vmatpush.msra.mxu0 %v1493_v15 }
 0x3b2   :  { %710 = vmatpush.msra.mxu0 %v1501_v18 }
 0x428   :  { %v304_v37 = vpop.f32.mrf.mxu0 }
 0x429   :  { %v305_v24 = vadd.f32 %v1433_v38, %v304_v37 }
 0x42b   :  { %v308_v25 = vmul.f32 0.70710677, %v305_v24  ;;  %v307_v54 = vmul.f32 0.5, %v305_v24 }
 0x42d   :  { %v309_v26 = vand.u32 2147483647, %v308_v25  ;;  %vm328_vm11 = vcmp.lt.f32.partialorder %v308_v25, 0.0 }
 0x42f   :  { %v310_v27 = vmul.f32 0.3275911, %v309_v26  ;;  %v322_v30 = vsub.f32 0.0, %v309_v26 }
 0x431   :  { %v311_v28 = vadd.f32 1.0, %v310_v27  ;;  %v323_v33 = vmul.f32 %v322_v30, %v309_v26 }
 0x433   :  { %1281 = vrcp.f32 %v311_v28  ;;  %v324_v36 = vmul.f32 1.442695, %v323_v33 }
 0x435   :  { %1283 = vpow2.f32 %v324_v36 }
 0x439   :  { %v1282_v29 = vpop.eup %1281 }
 0x43a   :  { %v313_v31 = vmul.f32 1.0614054, %v1282_v29 }
 0x43b   :  { %v1284_v49 = vpop.eup %1283 }
 0x43c   :  { %v314_v32 = vadd.f32 -1.4531521, %v313_v31 }
 0x43e   :  { %v315_v34 = vmul.f32 %v1282_v29, %v314_v32 }
 0x440   :  { %v316_v35 = vadd.f32 1.4214138, %v315_v34 }
 0x442   :  { %v317_v39 = vmul.f32 %v1282_v29, %v316_v35 }
 0x444   :  { %v318_v40 = vadd.f32 -0.28449672, %v317_v39 }
 0x446   :  { %v319_v41 = vmul.f32 %v1282_v29, %v318_v40 }
 0x448   :  { %v320_v43 = vadd.f32 0.2548296, %v319_v41 }
 0x44a   :  { %v321_v45 = vmul.f32 %v1282_v29, %v320_v43 }
 0x44c   :  { %v326_v50 = vmul.f32 %v1284_v49, %v321_v45 }
 0x44e   :  { %v327_v51 = vsub.f32 1.0, %v326_v50 }
 0x450   :  { %v329_v52 = vsub.f32 0.0, %v327_v51 }
 0x452   :  { %v330_v53 = vsel %vm328_vm11, %v329_v52, %v327_v51 }
 0x453   :  { %v331_v55 = vadd.f32 1.0, %v330_v53 }
 0x455   :  { %v332_v56 = vmul.f32 %v331_v55, %v307_v54 }
 0x457   :  { %1225 = vmatmul.msk.f32.vlgmr.msra.gmra.mxu1 %vm172_vm6, %v332_v56 }
 0x458   :  { %767 = vmatpush.msra.mxu1 %v1412_v16 }
 0x4d4   :  { %v353_v57 = vpop.f32.mrf.mxu1 }
 0x4d5   :  { %v354_v58 = vadd.f32 %v1472_v6, %v353_v57 }
 0x4d7   :  { %v357_v59 = vmul.f32 0.70710677, %v354_v58  ;;  %v356_v29 = vmul.f32 0.5, %v354_v58 }
 0x4d9   :  { %v358_v60 = vand.u32 2147483647, %v357_v59  ;;  %vm377_vm12 = vcmp.lt.f32.partialorder %v357_v59, 0.0 }
 0x4db   :  { %v359_v61 = vmul.f32 0.3275911, %v358_v60  ;;  %v371_v0 = vsub.f32 0.0, %v358_v60 }
 0x4dd   :  { %v360_v62 = vadd.f32 1.0, %v359_v61  ;;  %v372_v3 = vmul.f32 %v371_v0, %v358_v60  ;;  %v433_v0 = vmul.f32 %v1538_v9, %v1556_v23 }
 0x4df   :  { %1285 = vrcp.f32 %v360_v62  ;;  %v373_v10 = vmul.f32 1.442695, %v372_v3 }
 0x4e1   :  { %1287 = vpow2.f32 %v373_v10 }
 0x4e5   :  { %v1286_v63 = vpop.eup %1285 }
 0x4e6   :  { %v362_v1 = vmul.f32 1.0614054, %v1286_v63 }
 0x4e7   :  { %v1288_v24 = vpop.eup %1287 }
 0x4e8   :  { %v363_v2 = vadd.f32 -1.4531521, %v362_v1 }
 0x4ea   :  { %v364_v5 = vmul.f32 %v1286_v63, %v363_v2 }
 0x4ec   :  { %v365_v8 = vadd.f32 1.4214138, %v364_v5 }
 0x4ee   :  { %v366_v13 = vmul.f32 %v1286_v63, %v365_v8 }
 0x4f0   :  { %v367_v19 = vadd.f32 -0.28449672, %v366_v13 }
 0x4f2   :  { %v368_v20 = vmul.f32 %v1286_v63, %v367_v19 }
 0x4f4   :  { %v369_v22 = vadd.f32 0.2548296, %v368_v20 }
 0x4f6   :  { %v370_v37 = vmul.f32 %v1286_v63, %v369_v22 }
 0x4f8   :  { %v375_v25 = vmul.f32 %v1288_v24, %v370_v37 }
 0x4fa   :  { %v376_v26 = vsub.f32 1.0, %v375_v25 }
 0x4fc   :  { %v378_v27 = vsub.f32 0.0, %v376_v26 }
 0x4fe   :  { %v379_v28 = vsel %vm377_vm12, %v378_v27, %v376_v26 }
 0x4ff   :  { %v380_v30 = vadd.f32 1.0, %v379_v28 }
 0x501   :  { %v381_v31 = vmul.f32 %v380_v30, %v356_v29 }
 0x503   :  { %1226 = vmatmul.msk.f32.vlgmr.msra.gmra.mxu2 %vm172_vm6, %v381_v31 }
 0x504   :  { %813 = vmatpush.msra.mxu2 %v1439_v44 }
 0x506   :  { %814 = vmatpush.msra.mxu2 %v1446_v46 }
 0x508   :  { %815 = vmatpush.msra.mxu2 %v1454_v47 }
 0x50a   :  { %816 = vmatpush.msra.mxu2 %v1462_v48 }
 0x586   :  { %v402_v32 = vpop.f32.mrf.mxu2 }
 0x587   :  { %v403_v33 = vadd.f32 %v1517_v42, %v402_v32 }
 0x589   :  { %v405_v34 = vadd.f32 %v403_v33, %v1556_v23 }
 0x58b   :  { %v406_v35 = vsel %vm60_vm0, %v405_v34, 0.0  ;;  %v410_v36 = vmul.f32 %v405_v34, %v405_v34 }
 0x58c   :  { %407 = vadd.xlane.f32.xlu2 %v406_v35 }
 0x58d   :  { %v411_v39 = vsel %vm60_vm0, %v410_v36, 0.0 }
 0x594   :  { %412 = vadd.xlane.f32.xlu2 %v411_v39 }
 0x5ff   :  { %v408_v40 = vpop.xlane.xlu2 %407 }
 0x600   :  { %v409_v41 = vmul.f32 %v408_v40, %v1416_v17 }
 0x602   :  { %v415_v45 = vmul.f32 %v409_v41, %v409_v41  ;;  %v418_v59 = vsub.f32 %v405_v34, %v409_v41 }
 0x607   :  { %v413_v43 = vpop.xlane.xlu2 %412 }
 0x608   :  { %v414_v49 = vmul.f32 %v413_v43, %v1416_v17 }
 0x60a   :  { %v416_v50 = vsub.f32 %v414_v49, %v415_v45 }
 0x60c   :  { %v417_v51 = vmax.f32 %v416_v50, 0.0 }
 0x60e   :  { %v419_v52 = vadd.f32 1e-05, %v417_v51 }
 0x610   :  { %1289 = vrsqrt.f32 %v419_v52  ;;  %vm426_vm14 = vweird.f32 %v419_v52 }
 0x616   :  { %v1290_v53 = vpop.eup %1289 }
 0x617   :  { %v421_v54 = vmul.f32 %v1290_v53, %v419_v52  ;;  %vm427_vm13 = vweird.f32 %v1290_v53 }
 0x618   :  { %vm428_vm15 = vmor %vm426_vm14, %vm427_vm13 }
 0x619   :  { %v422_v55 = vmul.f32 %v1290_v53, %v421_v54 }
 0x61b   :  { %v423_v56 = vmul.f32 0.5, %v422_v55 }
 0x61d   :  { %v424_v57 = vsub.f32 1.5, %v423_v56 }
 0x61f   :  { %v425_v58 = vmul.f32 %v1290_v53, %v424_v57 }
 0x621   :  { %v429_v60 = vsel %vm428_vm15, %v1290_v53, %v425_v58 }
 0x622   :  { %v430_v61 = vmul.f32 %v429_v60, %v418_v59 }
 0x624   :  { %v431_v62 = vmul.f32 %v1528_v4, %v430_v61 }
 0x626   :  { %v432_v63 = vadd.f32 %v1533_v7, %v431_v62 }
 0x628   :  { %v434_v1 = vmul.f32 %v1544_v11, %v432_v63 }
 0x62a   :  { %v435_v2 = vadd.f32 %v434_v1, %v433_v0 }
 0x62c   :  { %v1587_v3 = vadd.f32 %v1553_v21, %v435_v2 }
 0x62e   :  { %438 = vst.msk [vmem:[#allocation2 + $0x8] sm:$0xff] %vm60_vm0, %v1587_v3  ;;  %1227 = vmatmul.msk.f32.vlgmr.msra.gmra.mxu3 %vm60_vm0, %v1587_v3 }
 0x62f   :  { %862 = vmatpush.msra.mxu3 %v1478_v12 }
 0x631   :  { %863 = vmatpush.msra.mxu3 %v1485_v14 }
 0x633   :  { %864 = vmatpush.msra.mxu3 %v1493_v15 }
 0x635   :  { %865 = vmatpush.msra.mxu3 %v1501_v18 }
 0x6b1   :  { %v459_v23 = vpop.f32.mrf.mxu3 }
 0x6b2   :  { %v460_v5 = vadd.f32 %v1433_v38, %v459_v23 }
 0x6b4   :  { %v463_v8 = vmul.f32 0.70710677, %v460_v5  ;;  %v462_v41 = vmul.f32 0.5, %v460_v5 }
 0x6b6   :  { %v464_v10 = vand.u32 2147483647, %v463_v8  ;;  %vm483_vm1 = vcmp.lt.f32.partialorder %v463_v8, 0.0 }
 0x6b8   :  { %v465_v13 = vmul.f32 0.3275911, %v464_v10  ;;  %v477_v22 = vsub.f32 0.0, %v464_v10 }
 0x6ba   :  { %v466_v19 = vadd.f32 1.0, %v465_v13  ;;  %v478_v25 = vmul.f32 %v477_v22, %v464_v10 }
 0x6bc   :  { %1291 = vrcp.f32 %v466_v19  ;;  %v479_v28 = vmul.f32 1.442695, %v478_v25 }
 0x6be   :  { %1293 = vpow2.f32 %v479_v28 }
 0x6c2   :  { %v1292_v20 = vpop.eup %1291 }
 0x6c3   :  { %v468_v37 = vmul.f32 1.0614054, %v1292_v20 }
 0x6c4   :  { %v1294_v34 = vpop.eup %1293 }
 0x6c5   :  { %v469_v24 = vadd.f32 -1.4531521, %v468_v37 }
 0x6c7   :  { %v470_v26 = vmul.f32 %v1292_v20, %v469_v24 }
 0x6c9   :  { %v471_v27 = vadd.f32 1.4214138, %v470_v26 }
 0x6cb   :  { %v472_v29 = vmul.f32 %v1292_v20, %v471_v27 }
 0x6cd   :  { %v473_v30 = vadd.f32 -0.28449672, %v472_v29 }
 0x6cf   :  { %v474_v31 = vmul.f32 %v1292_v20, %v473_v30 }
 0x6d1   :  { %v475_v32 = vadd.f32 0.2548296, %v474_v31 }
 0x6d3   :  { %v476_v33 = vmul.f32 %v1292_v20, %v475_v32 }
 0x6d5   :  { %v481_v35 = vmul.f32 %v1294_v34, %v476_v33 }
 0x6d7   :  { %v482_v36 = vsub.f32 1.0, %v481_v35 }
 0x6d9   :  { %v484_v39 = vsub.f32 0.0, %v482_v36 }
 0x6db   :  { %v485_v40 = vsel %vm483_vm1, %v484_v39, %v482_v36 }
 0x6dc   :  { %v486_v43 = vadd.f32 1.0, %v485_v40 }
 0x6de   :  { %v487_v45 = vmul.f32 %v486_v43, %v462_v41 }
 0x6e0   :  { %1228 = vmatmul.msk.f32.vlgmr.msrb.gmra.mxu0 %vm172_vm6, %v487_v45 }
 0x6e1   :  { %922 = vmatpush.msrb.mxu0 %v1412_v16 }
 0x75d   :  { %v508_v49 = vpop.f32.mrf.mxu0 }
 0x75e   :  { %v509_v50 = vadd.f32 %v1472_v6, %v508_v49 }
 0x760   :  { %v512_v51 = vmul.f32 0.70710677, %v509_v50  ;;  %v511_v19 = vmul.f32 0.5, %v509_v50 }
 0x762   :  { %v513_v52 = vand.u32 2147483647, %v512_v51  ;;  %vm532_vm2 = vcmp.lt.f32.partialorder %v512_v51, 0.0  ;;  %v588_v51 = vmul.f32 %v1538_v9, %v1587_v3 }
 0x764   :  { %v514_v53 = vmul.f32 0.3275911, %v513_v52  ;;  %v526_v56 = vsub.f32 0.0, %v513_v52 }
 0x766   :  { %v515_v54 = vadd.f32 1.0, %v514_v53  ;;  %v527_v59 = vmul.f32 %v526_v56, %v513_v52 }
 0x768   :  { %1295 = vrcp.f32 %v515_v54  ;;  %v528_v62 = vmul.f32 1.442695, %v527_v59 }
 0x76a   :  { %1297 = vpow2.f32 %v528_v62 }
 0x76e   :  { %v1296_v55 = vpop.eup %1295 }
 0x76f   :  { %v517_v57 = vmul.f32 1.0614054, %v1296_v55 }
 0x770   :  { %v1298_v23 = vpop.eup %1297 }
 0x771   :  { %v518_v58 = vadd.f32 -1.4531521, %v517_v57 }
 0x773   :  { %v519_v60 = vmul.f32 %v1296_v55, %v518_v58 }
 0x775   :  { %v520_v61 = vadd.f32 1.4214138, %v519_v60 }
 0x777   :  { %v521_v63 = vmul.f32 %v1296_v55, %v520_v61 }
 0x779   :  { %v522_v0 = vadd.f32 -0.28449672, %v521_v63 }
 0x77b   :  { %v523_v16 = vmul.f32 %v1296_v55, %v522_v0 }
 0x77d   :  { %v524_v1 = vadd.f32 0.2548296, %v523_v16 }
 0x77f   :  { %v525_v2 = vmul.f32 %v1296_v55, %v524_v1 }
 0x781   :  { %v530_v5 = vmul.f32 %v1298_v23, %v525_v2 }
 0x783   :  { %v531_v8 = vsub.f32 1.0, %v530_v5 }
 0x785   :  { %v533_v10 = vsub.f32 0.0, %v531_v8 }
 0x787   :  { %v534_v13 = vsel %vm532_vm2, %v533_v10, %v531_v8  ;;  %vm1209_vm2 = vcmask 130048  }
 0x788   :  { %v535_v20 = vadd.f32 1.0, %v534_v13 }
 0x78a   :  { %v536_v22 = vmul.f32 %v535_v20, %v511_v19 }
 0x78c   :  { %1229 = vmatmul.msk.f32.vlgmr.msrb.gmra.mxu1 %vm172_vm6, %v536_v22 }
 0x78d   :  { %968 = vmatpush.msrb.mxu1 %v1439_v44 }
 0x78f   :  { %969 = vmatpush.msrb.mxu1 %v1446_v46 }
 0x791   :  { %970 = vmatpush.msrb.mxu1 %v1454_v47 }
 0x793   :  { %971 = vmatpush.msrb.mxu1 %v1462_v48 }
 0x809   :  { %v557_v37 = vpop.f32.mrf.mxu1 }
 0x80a   :  { %v558_v24 = vadd.f32 %v1517_v42, %v557_v37 }
 0x80c   :  { %v560_v25 = vadd.f32 %v558_v24, %v1587_v3 }
 0x80e   :  { %v561_v26 = vsel %vm60_vm0, %v560_v25, 0.0  ;;  %v565_v27 = vmul.f32 %v560_v25, %v560_v25 }
 0x80f   :  { %562 = vadd.xlane.f32.xlu0 %v561_v26 }
 0x810   :  { %v566_v28 = vsel %vm60_vm0, %v565_v27, 0.0 }
 0x811   :  { %567 = vadd.xlane.f32.xlu1 %v566_v28 }
 0x882   :  { %v563_v29 = vpop.xlane.xlu0 %562 }
 0x883   :  { %v564_v44 = vmul.f32 %v563_v29, %v1416_v17 }
 0x884   :  { %v568_v46 = vpop.xlane.xlu1 %567 }
 0x885   :  { %v570_v30 = vmul.f32 %v564_v44, %v564_v44  ;;  %v569_v47 = vmul.f32 %v568_v46, %v1416_v17  ;;  %v573_v41 = vsub.f32 %v560_v25, %v564_v44 }
 0x887   :  { %v571_v48 = vsub.f32 %v569_v47, %v570_v30 }
 0x889   :  { %v572_v31 = vmax.f32 %v571_v48, 0.0 }
 0x88b   :  { %v574_v32 = vadd.f32 1e-05, %v572_v31 }
 0x88d   :  { %1299 = vrsqrt.f32 %v574_v32  ;;  %vm581_vm4 = vweird.f32 %v574_v32 }
 0x893   :  { %v1300_v33 = vpop.eup %1299 }
 0x894   :  { %v576_v34 = vmul.f32 %v1300_v33, %v574_v32  ;;  %vm582_vm3 = vweird.f32 %v1300_v33 }
 0x895   :  { %vm583_vm5 = vmor %vm581_vm4, %vm582_vm3 }
 0x896   :  { %v577_v35 = vmul.f32 %v1300_v33, %v576_v34 }
 0x898   :  { %v578_v36 = vmul.f32 0.5, %v577_v35 }
 0x89a   :  { %v579_v39 = vsub.f32 1.5, %v578_v36 }
 0x89c   :  { %v580_v40 = vmul.f32 %v1300_v33, %v579_v39 }
 0x89e   :  { %v584_v43 = vsel %vm583_vm5, %v1300_v33, %v580_v40 }
 0x89f   :  { %v585_v45 = vmul.f32 %v584_v43, %v573_v41 }
 0x8a1   :  { %v586_v49 = vmul.f32 %v1528_v4, %v585_v45 }
 0x8a3   :  { %v587_v50 = vadd.f32 %v1533_v7, %v586_v49 }
 0x8a5   :  { %v589_v52 = vmul.f32 %v1544_v11, %v587_v50 }
 0x8a7   :  { %v590_v53 = vadd.f32 %v589_v52, %v588_v51 }
 0x8a9   :  { %v1618_v54 = vadd.f32 %v1553_v21, %v590_v53 }
 0x8ab   :  { %593 = vst.msk [vmem:[#allocation2 + $0x10] sm:$0xff] %vm60_vm0, %v1618_v54  ;;  %1230 = vmatmul.msk.f32.vlgmr.msrb.gmra.mxu2 %vm60_vm0, %v1618_v54 }
 0x8ac   :  { %1017 = vmatpush.msrb.mxu2 %v1478_v12 }
 0x8ae   :  { %1018 = vmatpush.msrb.mxu2 %v1485_v14 }
 0x8b0   :  { %1019 = vmatpush.msrb.mxu2 %v1493_v15 }
 0x8b2   :  { %1020 = vmatpush.msrb.mxu2 %v1501_v18 }
 0x92e   :  { %v614_v3 = vpop.f32.mrf.mxu2 }
 0x92f   :  { %v615_v55 = vadd.f32 %v1433_v38, %v614_v3 }
 0x931   :  { %v618_v56 = vmul.f32 0.70710677, %v615_v55  ;;  %v617_v20 = vmul.f32 0.5, %v615_v55 }
 0x933   :  { %v619_v57 = vand.u32 2147483647, %v618_v56  ;;  %vm638_vm7 = vcmp.lt.f32.partialorder %v618_v56, 0.0 }
 0x935   :  { %v620_v58 = vmul.f32 0.3275911, %v619_v57  ;;  %v632_v61 = vsub.f32 0.0, %v619_v57 }
 0x937   :  { %v621_v59 = vadd.f32 1.0, %v620_v58  ;;  %v633_v0 = vmul.f32 %v632_v61, %v619_v57 }
 0x939   :  { %1301 = vrcp.f32 %v621_v59  ;;  %v634_v14 = vmul.f32 1.442695, %v633_v0 }
 0x93b   :  { %1303 = vpow2.f32 %v634_v14 }
 0x93f   :  { %v1302_v60 = vpop.eup %1301 }
 0x940   :  { %v623_v62 = vmul.f32 1.0614054, %v1302_v60 }
 0x941   :  { %v1304_v5 = vpop.eup %1303 }
 0x942   :  { %v624_v63 = vadd.f32 -1.4531521, %v623_v62 }
 0x944   :  { %v625_v12 = vmul.f32 %v1302_v60, %v624_v63 }
 0x946   :  { %v626_v16 = vadd.f32 1.4214138, %v625_v12 }
 0x948   :  { %v627_v1 = vmul.f32 %v1302_v60, %v626_v16 }
 0x94a   :  { %v628_v15 = vadd.f32 -0.28449672, %v627_v1 }
 0x94c   :  { %v629_v18 = vmul.f32 %v1302_v60, %v628_v15 }
 0x94e   :  { %v630_v2 = vadd.f32 0.2548296, %v629_v18 }
 0x950   :  { %v631_v23 = vmul.f32 %v1302_v60, %v630_v2 }
 0x952   :  { %v636_v8 = vmul.f32 %v1304_v5, %v631_v23 }
 0x954   :  { %v637_v10 = vsub.f32 1.0, %v636_v8 }
 0x956   :  { %v639_v13 = vsub.f32 0.0, %v637_v10 }
 0x958   :  { %v640_v19 = vsel %vm638_vm7, %v639_v13, %v637_v10 }
 0x959   :  { %v641_v22 = vadd.f32 1.0, %v640_v19 }
 0x95b   :  { %v642_v37 = vmul.f32 %v641_v22, %v617_v20  ;;  %v743_v22 = vmul.f32 %v1538_v9, %v1618_v54 }
 0x95d   :  { %1231 = vmatmul.msk.f32.vlgmr.msrb.gmra.mxu3 %vm172_vm6, %v642_v37 }
 0x9e0   :  { %v663_v24 = vpop.f32.mrf.mxu3 }
 0x9e1   :  { %v664_v25 = vadd.f32 %v1472_v6, %v663_v24 }
 0x9e3   :  { %v667_v26 = vmul.f32 0.70710677, %v664_v25  ;;  %v666_v51 = vmul.f32 0.5, %v664_v25 }
 0x9e5   :  { %v668_v27 = vand.u32 2147483647, %v667_v26  ;;  %vm687_vm8 = vcmp.lt.f32.partialorder %v667_v26, 0.0 }
 0x9e7   :  { %v669_v28 = vmul.f32 0.3275911, %v668_v27  ;;  %v681_v46 = vsub.f32 0.0, %v668_v27 }
 0x9e9   :  { %v670_v29 = vadd.f32 1.0, %v669_v28  ;;  %v682_v48 = vmul.f32 %v681_v46, %v668_v27 }
 0x9eb   :  { %1305 = vrcp.f32 %v670_v29  ;;  %v683_v33 = vmul.f32 1.442695, %v682_v48 }
 0x9ed   :  { %1307 = vpow2.f32 %v683_v33 }
 0x9f1   :  { %v1306_v44 = vpop.eup %1305 }
 0x9f2   :  { %v672_v30 = vmul.f32 1.0614054, %v1306_v44 }
 0x9f3   :  { %v1308_v41 = vpop.eup %1307 }
 0x9f4   :  { %v673_v47 = vadd.f32 -1.4531521, %v672_v30 }
 0x9f6   :  { %v674_v31 = vmul.f32 %v1306_v44, %v673_v47 }
 0x9f8   :  { %v675_v32 = vadd.f32 1.4214138, %v674_v31 }
 0x9fa   :  { %v676_v34 = vmul.f32 %v1306_v44, %v675_v32 }
 0x9fc   :  { %v677_v35 = vadd.f32 -0.28449672, %v676_v34 }
 0x9fe   :  { %v678_v36 = vmul.f32 %v1306_v44, %v677_v35 }
 0xa00   :  { %v679_v39 = vadd.f32 0.2548296, %v678_v36 }
 0xa02   :  { %v680_v40 = vmul.f32 %v1306_v44, %v679_v39 }
 0xa04   :  { %v685_v43 = vmul.f32 %v1308_v41, %v680_v40 }
 0xa06   :  { %v686_v45 = vsub.f32 1.0, %v685_v43 }
 0xa08   :  { %v688_v49 = vsub.f32 0.0, %v686_v45 }
 0xa0a   :  { %v689_v50 = vsel %vm687_vm8, %v688_v49, %v686_v45 }
 0xa0b   :  { %v690_v52 = vadd.f32 1.0, %v689_v50 }
 0xa0d   :  { %v691_v53 = vmul.f32 %v690_v52, %v666_v51 }
 0xa0f   :  { %1232 = vmatmul.msk.f32.vlgmr.msra.gmra.mxu0 %vm172_vm6, %v691_v53 }
 0xa8c   :  { %v712_v3 = vpop.f32.mrf.mxu0 }
 0xa8d   :  { %v713_v55 = vadd.f32 %v1517_v42, %v712_v3 }
 0xa8f   :  { %v715_v56 = vadd.f32 %v713_v55, %v1618_v54 }
 0xa91   :  { %v716_v57 = vsel %vm60_vm0, %v715_v56, 0.0  ;;  %v720_v58 = vmul.f32 %v715_v56, %v715_v56 }
 0xa92   :  { %717 = vadd.xlane.f32.xlu2 %v716_v57 }
 0xa93   :  { %v721_v59 = vsel %vm60_vm0, %v720_v58, 0.0 }
 0xa94   :  { %722 = vadd.xlane.f32.xlu0 %v721_v59 }
 0xb05   :  { %v718_v60 = vpop.xlane.xlu2 %717 }
 0xb06   :  { %v719_v61 = vmul.f32 %v718_v60, %v1416_v17  ;;  %v35_v60 = vld [vmem:[%s1801_s2] sm:$0xff] }
 0xb07   :  { %v723_v62 = vpop.xlane.xlu0 %722  ;;  %1245 = vmatpush.msrb.mxu3 %v35_v60 }
 0xb08   :  { %v725_v63 = vmul.f32 %v719_v61, %v719_v61  ;;  %v724_v0 = vmul.f32 %v723_v62, %v1416_v17  ;;  %v728_v8 = vsub.f32 %v715_v56, %v719_v61 }
 0xb0a   :  { %v726_v12 = vsub.f32 %v724_v0, %v725_v63 }
 0xb0c   :  { %v727_v16 = vmax.f32 %v726_v12, 0.0 }
 0xb0e   :  { %v729_v14 = vadd.f32 1e-05, %v727_v16 }
 0xb10   :  { %1309 = vrsqrt.f32 %v729_v14  ;;  %vm736_vm10 = vweird.f32 %v729_v14 }
 0xb16   :  { %v1310_v1 = vpop.eup %1309 }
 0xb17   :  { %v731_v15 = vmul.f32 %v1310_v1, %v729_v14  ;;  %vm737_vm9 = vweird.f32 %v1310_v1 }
 0xb18   :  { %vm738_vm11 = vmor %vm736_vm10, %vm737_vm9 }
 0xb19   :  { %v732_v18 = vmul.f32 %v1310_v1, %v731_v15 }
 0xb1b   :  { %v733_v2 = vmul.f32 0.5, %v732_v18 }
 0xb1d   :  { %v734_v23 = vsub.f32 1.5, %v733_v2 }
 0xb1f   :  { %v735_v5 = vmul.f32 %v1310_v1, %v734_v23 }
 0xb21   :  { %v739_v10 = vsel %vm738_vm11, %v1310_v1, %v735_v5 }
 0xb22   :  { %v740_v13 = vmul.f32 %v739_v10, %v728_v8 }
 0xb24   :  { %v741_v19 = vmul.f32 %v1528_v4, %v740_v13 }
 0xb26   :  { %v742_v20 = vadd.f32 %v1533_v7, %v741_v19 }
 0xb28   :  { %v744_v37 = vmul.f32 %v1544_v11, %v742_v20 }
 0xb2a   :  { %v745_v24 = vadd.f32 %v744_v37, %v743_v22 }
 0xb2c   :  { %v1644_v25 = vadd.f32 %v1553_v21, %v745_v24  ;;  %v1061_v24 = vld [vmem:[#allocation2 + $0x10] sm:$0xff] }
 0xb2e   :  { %748 = vst.msk [vmem:[#allocation2 + $0x18] sm:$0xff] %vm60_vm0, %v1644_v25  ;;  %1233 = vmatmul.msk.f32.vlgmr.msra.gmra.mxu1 %vm60_vm0, %v1644_v25 }
 0xb2f   :  { %1098 = vmatpush.msra.mxu1 %v35_v60 }
 0xbab   :  { %v769_v26 = vpop.f32.mrf.mxu1 }
 0xbac   :  { %v770_v27 = vadd.f32 %v1433_v38, %v769_v26  ;;  %v1062_v26 = vld [vmem:[#allocation2 + $0x18] sm:$0xff] }
 0xbae   :  { %v773_v28 = vmul.f32 0.70710677, %v770_v27  ;;  %v772_v51 = vmul.f32 0.5, %v770_v27  ;;  %v1340_v27 = vmov 0  }
 0xbaf   :  { %1249 = vset.pattern.permute.xlu2 %v1340_v27  ;;  %1250 = vset.pattern.permute.xlu0 %v1340_v27 }
 0xbb0   :  { %v774_v29 = vand.u32 2147483647, %v773_v28  ;;  %vm793_vm12 = vcmp.lt.f32.partialorder %v773_v28, 0.0  ;;  %1251 = vset.pattern.permute.xlu1 %v1340_v27 }
 0xbb2   :  { %v775_v44 = vmul.f32 0.3275911, %v774_v29  ;;  %v787_v30 = vsub.f32 0.0, %v774_v29 }
 0xbb4   :  { %v776_v46 = vadd.f32 1.0, %v775_v44  ;;  %v788_v31 = vmul.f32 %v787_v30, %v774_v29 }
 0xbb6   :  { %1311 = vrcp.f32 %v776_v46  ;;  %v789_v34 = vmul.f32 1.442695, %v788_v31  ;;  %v1341_v31 = vmov 1  }
 0xbb8   :  { %1313 = vpow2.f32 %v789_v34 }
 0xbbc   :  { %v1312_v54 = vpop.eup %1311 }
 0xbbd   :  { %v778_v47 = vmul.f32 1.0614054, %v1312_v54 }
 0xbbe   :  { %v1314_v38 = vpop.eup %1313 }
 0xbbf   :  { %v779_v48 = vadd.f32 -1.4531521, %v778_v47  ;;  %v1118_v47 = vld [vmem:[%s1802_s0] sm:$0xff] }
 0xbc1   :  { %v780_v32 = vmul.f32 %v1312_v54, %v779_v48  ;;  %v1121_v48 = vld [vmem:[%s1802_s0 + $0x18] sm:$0xff] }
 0xbc3   :  { %v781_v33 = vadd.f32 1.4214138, %v780_v32 }
 0xbc5   :  { %v782_v35 = vmul.f32 %v1312_v54, %v781_v33 }
 0xbc7   :  { %v783_v36 = vadd.f32 -0.28449672, %v782_v35 }
 0xbc9   :  { %v784_v39 = vmul.f32 %v1312_v54, %v783_v36 }
 0xbcb   :  { %v785_v40 = vadd.f32 0.2548296, %v784_v39 }
 0xbcd   :  { %v786_v41 = vmul.f32 %v1312_v54, %v785_v40 }
 0xbcf   :  { %v791_v43 = vmul.f32 %v1314_v38, %v786_v41 }
 0xbd1   :  { %v792_v45 = vsub.f32 1.0, %v791_v43 }
 0xbd3   :  { %v794_v49 = vsub.f32 0.0, %v792_v45 }
 0xbd5   :  { %v795_v50 = vsel %vm793_vm12, %v794_v49, %v792_v45 }
 0xbd6   :  { %v796_v52 = vadd.f32 1.0, %v795_v50 }
 0xbd8   :  { %v797_v53 = vmul.f32 %v796_v52, %v772_v51 }
 0xbda   :  { %1234 = vmatmul.msk.f32.vlgmr.msra.gmra.mxu2 %vm172_vm6, %v797_v53 }
 0xc5d   :  { %v818_v3 = vpop.f32.mrf.mxu2 }
 0xc5e   :  { %v819_v55 = vadd.f32 %v1472_v6, %v818_v3 }
 0xc60   :  { %v822_v56 = vmul.f32 0.70710677, %v819_v55  ;;  %v821_v20 = vmul.f32 0.5, %v819_v55 }
 0xc62   :  { %v823_v57 = vand.u32 2147483647, %v822_v56  ;;  %vm842_vm13 = vcmp.lt.f32.partialorder %v822_v56, 0.0 }
 0xc64   :  { %v824_v58 = vmul.f32 0.3275911, %v823_v57  ;;  %v836_v62 = vsub.f32 0.0, %v823_v57 }
 0xc66   :  { %v825_v59 = vadd.f32 1.0, %v824_v58  ;;  %v837_v12 = vmul.f32 %v836_v62, %v823_v57  ;;  %v36_v58 = vld [vmem:[%s1803_s3] sm:$0x1] }
 0xc68   :  { %1315 = vrcp.f32 %v825_v59  ;;  %v838_v1 = vmul.f32 1.442695, %v837_v12 }
 0xc6a   :  { %1317 = vpow2.f32 %v838_v1  ;;  %v1697_v1 = vld [vmem:[%s1803_s3] ss:$0 sm:$0xff] }
 0xc6e   :  { %v1316_v61 = vpop.eup %1315 }
 0xc6f   :  { %v827_v63 = vmul.f32 1.0614054, %v1316_v61 }
 0xc70   :  { %v1318_v5 = vpop.eup %1317 }
 0xc71   :  { %v828_v0 = vadd.f32 -1.4531521, %v827_v63  ;;  %v898_v63 = vmul.f32 %v1538_v9, %v1644_v25 }
 0xc73   :  { %v829_v16 = vmul.f32 %v1316_v61, %v828_v0 }
 0xc75   :  { %v830_v14 = vadd.f32 1.4214138, %v829_v16 }
 0xc77   :  { %v831_v6 = vmul.f32 %v1316_v61, %v830_v14 }
 0xc79   :  { %v832_v15 = vadd.f32 -0.28449672, %v831_v6 }
 0xc7b   :  { %v833_v18 = vmul.f32 %v1316_v61, %v832_v15 }
 0xc7d   :  { %v834_v2 = vadd.f32 0.2548296, %v833_v18 }
 0xc7f   :  { %v835_v23 = vmul.f32 %v1316_v61, %v834_v2  ;;  %v1124_v61 = vsub.f32 1.0, %v36_v58  ;;  %v1331_v2 = vld [vmem:[%s1797_s9] ss:$0 sm:$0xff] }
 0xc81   :  { %v840_v8 = vmul.f32 %v1318_v5, %v835_v23  ;;  %v1692_v16 = vperm.slane %v1124_v61, 0 }
 0xc83   :  { %v841_v10 = vsub.f32 1.0, %v840_v8 }
 0xc85   :  { %v843_v13 = vsub.f32 0.0, %v841_v10 }
 0xc87   :  { %v844_v19 = vsel %vm842_vm13, %v843_v13, %v841_v10 }
 0xc88   :  { %v845_v22 = vadd.f32 1.0, %v844_v19 }
 0xc8a   :  { %v846_v37 = vmul.f32 %v845_v22, %v821_v20 }
 0xc8c   :  { %1235 = vmatmul.msk.f32.vlgmr.msra.gmra.mxu3 %vm172_vm6, %v846_v37 }
 0xc94   :  { %1241 = vmatmul.msk.f32.vlgmr.msrb.gmra.mxu3 %vm60_vm0, %v1061_v24 }
 0xc9c   :  { %1242 = vmatmul.msk.f32.gmra.mxu3 %vm60_vm0, %v1062_v26 }
 0xd0f   :  { %v867_v28 = vpop.f32.mrf.mxu3 }
 0xd10   :  { %v868_v29 = vadd.f32 %v1517_v42, %v867_v28  ;;  %v1672_v42 = vld [vmem:[%s1802_s0 + $0x20] sm:$0xff] }
 0xd12   :  { %v870_v44 = vadd.f32 %v868_v29, %v1644_v25 }
 0xd14   :  { %v871_v46 = vsel %vm60_vm0, %v870_v44, 0.0  ;;  %v875_v54 = vmul.f32 %v870_v44, %v870_v44 }
 0xd15   :  { %872 = vadd.xlane.f32.xlu1 %v871_v46 }
 0xd16   :  { %v876_v30 = vsel %vm60_vm0, %v875_v54, 0.0 }
 0xd17   :  { %877 = vadd.xlane.f32.xlu2 %v876_v30  ;;  %v1690_v12 = vpop.f32.mrf.mxu3 }
 0xd1f   :  { %v1109_v6 = vpop.f32.mrf.mxu3 }
 0xd2f   :  { %1127 = vperm.xlu2 %1249, %v1118_v47  }
 0xd37   :  { %1142 = vperm.xlu2 %1249, %v1121_v48  }
 0xd3f   :  { %1147 = vperm.xlu2 %1249, %v1672_v42  }
 0xd47   :  { %1252 = vset.pattern.permute.xlu2 %v1341_v31 }
 0xd48   :  { %1165 = vperm.xlu2 %1252, %v1118_v47  }
 0xd50   :  { %1177 = vperm.xlu2 %1252, %v1121_v48  }
 0xd88   :  { %v873_v32 = vpop.xlane.xlu1 %872 }
 0xd89   :  { %v874_v33 = vmul.f32 %v873_v32, %v1416_v17 }
 0xd8a   :  { %v878_v34 = vpop.xlane.xlu2 %877 }
 0xd8b   :  { %v880_v35 = vmul.f32 %v874_v33, %v874_v33  ;;  %v879_v36 = vmul.f32 %v878_v34, %v1416_v17  ;;  %v883_v55 = vsub.f32 %v870_v44, %v874_v33 }
 0xd8d   :  { %v881_v39 = vsub.f32 %v879_v36, %v880_v35 }
 0xd8f   :  { %v882_v40 = vmax.f32 %v881_v39, 0.0 }
 0xd91   :  { %v884_v41 = vadd.f32 1e-05, %v882_v40  ;;  %v1059_v40 = vld [vmem:[#allocation2] sm:$0xff] }
 0xd92   :  { %v1678_v38 = vpop.permute.xlu2 %1127 }
 0xd93   :  { %1319 = vrsqrt.f32 %v884_v41  ;;  %vm891_vm15 = vweird.f32 %v884_v41 }
 0xd99   :  { %v1320_v43 = vpop.eup %1319 }
 0xd9a   :  { %v886_v45 = vmul.f32 %v1320_v43, %v884_v41  ;;  %v1143_v49 = vpop.permute.xlu2 %1142  ;;  %vm892_vm14 = vweird.f32 %v1320_v43  ;;  %v1060_v41 = vld [vmem:[#allocation2 + $0x8] sm:$0xff] }
 0xd9b   :  { %vm893_vm1 = vmor %vm891_vm15, %vm892_vm14 }
 0xd9c   :  { %v887_v50 = vmul.f32 %v1320_v43, %v886_v45 }
 0xd9e   :  { %v888_v51 = vmul.f32 0.5, %v887_v50 }
 0xda0   :  { %v889_v52 = vsub.f32 1.5, %v888_v51  ;;  %v1332_v51 = vld [vmem:[%s1797_s9 + $0x1] ss:$0 sm:$0xff] }
 0xda2   :  { %v890_v53 = vmul.f32 %v1320_v43, %v889_v52  ;;  %v1680_v3 = vpop.permute.xlu2 %1147 }
 0xda4   :  { %v894_v56 = vsel %vm893_vm1, %v1320_v43, %v890_v53  ;;  %v1158_v43 = vmul.f32 %v1692_v16, %v1678_v38 }
 0xda5   :  { %v895_v57 = vmul.f32 %v894_v56, %v883_v55 }
 0xda7   :  { %v896_v59 = vmul.f32 %v1528_v4, %v895_v57 }
 0xda9   :  { %v897_v60 = vadd.f32 %v1533_v7, %v896_v59  ;;  %v1161_v7 = vmul.f32 %v1692_v16, %v1143_v49 }
 0xdaa   :  { %v1166_v62 = vpop.permute.xlu2 %1165 }
 0xdab   :  { %v899_v0 = vmul.f32 %v1544_v11, %v897_v60  ;;  %v1191_v45 = vmul.f32 %v1697_v1, %v1166_v62 }
 0xdad   :  { %v900_v14 = vadd.f32 %v899_v0, %v898_v63  ;;  %v1197_v49 = vadd.f32 %v1191_v45, %v1158_v43 }
 0xdaf   :  { %v1700_v4 = vadd.f32 %v1553_v21, %v900_v14 }
 0xdb1   :  { %903 = vst.msk [vmem:[#allocation2 + $0x20] sm:$0xff] %vm60_vm0, %v1700_v4  ;;  %1236 = vmatmul.msk.f32.vlgmr.msrb.gmra.mxu0 %vm60_vm0, %v1700_v4 }
 0xdb2   :  { %v1178_v9 = vpop.permute.xlu2 %1177 }
 0xdb3   :  { %v1194_v11 = vmul.f32 %v1697_v1, %v1178_v9 }
 0xdb5   :  { %v1200_v25 = vadd.f32 %v1194_v11, %v1161_v7 }
 0xdb7   :  { %v1206_v15 = vadd.f32 %v1200_v25, %v1109_v6 }
 0xdb8   :  { %v1063_v18 = vld [vmem:[#allocation2 + $0x20] sm:$0xff] }
 0xdb9   :  { %1213 = vst.msk [vmem:[%s1804_s10 + $0x18] sm:$0xff] %vm1209_vm2, %v1206_v15  ;;  %1243 = vmatmul.msk.f32.gmra.mxu3 %vm60_vm0, %v1063_v18 }
 0xe2e   :  { %v924_v21 = vpop.f32.mrf.mxu0 }
 0xe2f   :  { %v925_v23 = vadd.f32 %v1331_v2, %v924_v21 }
 0xe31   :  { %v928_v5 = vmul.f32 0.70710677, %v925_v23  ;;  %v927_v35 = vmul.f32 0.5, %v925_v23 }
 0xe33   :  { %v929_v8 = vand.u32 2147483647, %v928_v5  ;;  %vm948_vm3 = vcmp.lt.f32.partialorder %v928_v5, 0.0 }
 0xe35   :  { %v930_v10 = vmul.f32 0.3275911, %v929_v8  ;;  %v942_v20 = vsub.f32 0.0, %v929_v8 }
 0xe37   :  { %v931_v13 = vadd.f32 1.0, %v930_v10  ;;  %v943_v24 = vmul.f32 %v942_v20, %v929_v8  ;;  %v1333_v20 = vld [vmem:[%s1796_s8 + $0x3] ss:$0 sm:$0xff] }
 0xe39   :  { %1321 = vrcp.f32 %v931_v13  ;;  %v944_v28 = vmul.f32 1.442695, %v943_v24  ;;  %v1123_v24 = vld [vmem:[%s1802_s0 + $0x28] sm:$0xff] }
 0xe3a   :  { %1185 = vperm.xlu2 %1252, %v1123_v24  }
 0xe3b   :  { %1323 = vpow2.f32 %v944_v28 }
 0xe3f   :  { %v1322_v19 = vpop.eup %1321 }
 0xe40   :  { %v933_v22 = vmul.f32 1.0614054, %v1322_v19 }
 0xe41   :  { %v1324_v47 = vpop.eup %1323 }
 0xe42   :  { %v934_v37 = vadd.f32 -1.4531521, %v933_v22 }
 0xe44   :  { %v935_v26 = vmul.f32 %v1322_v19, %v934_v37 }
 0xe46   :  { %v936_v27 = vadd.f32 1.4214138, %v935_v26 }
 0xe48   :  { %v937_v29 = vmul.f32 %v1322_v19, %v936_v27 }
 0xe4a   :  { %v938_v44 = vadd.f32 -0.28449672, %v937_v29  ;;  %v1119_v29 = vld [vmem:[%s1802_s0 + $0x8] sm:$0xff] }
 0xe4c   :  { %v939_v46 = vmul.f32 %v1322_v19, %v938_v44  ;;  %v1120_v44 = vld [vmem:[%s1802_s0 + $0x10] sm:$0xff] }
 0xe4e   :  { %v940_v54 = vadd.f32 0.2548296, %v939_v46 }
 0xe50   :  { %v941_v30 = vmul.f32 %v1322_v19, %v940_v54 }
 0xe52   :  { %v946_v48 = vmul.f32 %v1324_v47, %v941_v30 }
 0xe54   :  { %v947_v32 = vsub.f32 1.0, %v946_v48 }
 0xe56   :  { %v949_v33 = vsub.f32 0.0, %v947_v32 }
 0xe58   :  { %v950_v34 = vsel %vm948_vm3, %v949_v33, %v947_v32 }
 0xe59   :  { %v951_v36 = vadd.f32 1.0, %v950_v34 }
 0xe5b   :  { %v952_v39 = vmul.f32 %v951_v36, %v927_v35 }
 0xe5d   :  { %1237 = vmatmul.msk.f32.vlgmr.msrb.gmra.mxu1 %vm172_vm6, %v952_v39 }
 0xe65   :  { %1239 = vmatmul.msk.f32.vlgmr.msra.gmra.mxu1 %vm60_vm0, %v1059_v40 }
 0xe6d   :  { %1240 = vmatmul.msk.f32.gmra.mxu1 %vm60_vm0, %v1060_v41 }
 0xeda   :  { %v973_v50 = vpop.f32.mrf.mxu1 }
 0xedb   :  { %v974_v52 = vadd.f32 %v1332_v51, %v973_v50 }
 0xedd   :  { %v977_v53 = vmul.f32 0.70710677, %v974_v52  ;;  %v976_v8 = vmul.f32 0.5, %v974_v52 }
 0xedf   :  { %v978_v55 = vand.u32 2147483647, %v977_v53  ;;  %vm997_vm4 = vcmp.lt.f32.partialorder %v977_v53, 0.0  ;;  %v1334_v53 = vld [vmem:[%s1796_s8 + $0x4] ss:$0 sm:$0xff] }
 0xee1   :  { %v979_v56 = vmul.f32 0.3275911, %v978_v55  ;;  %v991_v60 = vsub.f32 0.0, %v978_v55 }
 0xee2   :  { %v1100_v57 = vpop.f32.mrf.mxu1 }
 0xee3   :  { %v980_v58 = vadd.f32 1.0, %v979_v56  ;;  %v1203_v59 = vadd.f32 %v1197_v49, %v1100_v57  ;;  %v992_v63 = vmul.f32 %v991_v60, %v978_v55  ;;  %v1335_v57 = vld [vmem:[%s1796_s8 + $0x5] ss:$0 sm:$0xff]  ;;  %v1336_v60 = vld [vmem:[%s1796_s8 + $0x6] ss:$0 sm:$0xff] }
 0xee5   :  { %1325 = vrcp.f32 %v980_v58  ;;  %1210 = vst.msk [vmem:[%s1804_s10] sm:$0xff] %vm1209_vm2, %v1203_v59  ;;  %v993_v7 = vmul.f32 1.442695, %v992_v63 }
 0xee7   :  { %1327 = vpow2.f32 %v993_v7 }
 0xeeb   :  { %v1326_v38 = vpop.eup %1325 }
 0xeec   :  { %v982_v61 = vmul.f32 1.0614054, %v1326_v38 }
 0xeed   :  { %v1328_v18 = vpop.eup %1327 }
 0xeee   :  { %v983_v62 = vadd.f32 -1.4531521, %v982_v61  ;;  %v1053_v61 = vmul.f32 %v1336_v60, %v1700_v4 }
 0xef0   :  { %v984_v0 = vmul.f32 %v1326_v38, %v983_v62  ;;  %v1337_v62 = vld [vmem:[%s1796_s8 + $0x7] ss:$0 sm:$0xff] }
 0xef2   :  { %v985_v14 = vadd.f32 1.4214138, %v984_v0 }
 0xef4   :  { %v986_v9 = vmul.f32 %v1326_v38, %v985_v14 }
 0xef6   :  { %v987_v11 = vadd.f32 -0.28449672, %v986_v9 }
 0xef8   :  { %v988_v25 = vmul.f32 %v1326_v38, %v987_v11 }
 0xefa   :  { %v989_v6 = vadd.f32 0.2548296, %v988_v25  ;;  %v1103_v25 = vpop.f32.mrf.mxu1 }
 0xefc   :  { %v990_v15 = vmul.f32 %v1326_v38, %v989_v6 }
 0xefe   :  { %v995_v21 = vmul.f32 %v1328_v18, %v990_v15  ;;  %v1162_v18 = vmul.f32 %v1692_v16, %v1680_v3 }
 0xf00   :  { %v996_v2 = vsub.f32 1.0, %v995_v21 }
 0xf02   :  { %v998_v23 = vsub.f32 0.0, %v996_v2 }
 0xf04   :  { %v999_v5 = vsel %vm997_vm4, %v998_v23, %v996_v2 }
 0xf05   :  { %v1000_v10 = vadd.f32 1.0, %v999_v5  ;;  %v1112_v5 = vpop.f32.mrf.mxu3 }
 0xf07   :  { %v1001_v13 = vmul.f32 %v1000_v10, %v976_v8  ;;  %v1186_v10 = vpop.permute.xlu2 %1185 }
 0xf08   :  { %v1196_v3 = vmul.f32 %v1697_v1, %v1186_v10 }
 0xf09   :  { %1238 = vmatmul.msk.f32.vlgmr.msrb.gmra.mxu2 %vm172_vm6, %v1001_v13 }
 0xf8c   :  { %v1022_v19 = vpop.f32.mrf.mxu2 }
 0xf8d   :  { %v1023_v22 = vadd.f32 %v1333_v20, %v1022_v19 }
 0xf8f   :  { %v1025_v37 = vadd.f32 %v1023_v22, %v1700_v4 }
 0xf91   :  { %v1026_v26 = vsel %vm60_vm0, %v1025_v37, 0.0  ;;  %v1030_v27 = vmul.f32 %v1025_v37, %v1025_v37 }
 0xf92   :  { %1027 = vadd.xlane.f32.xlu0 %v1026_v26 }
 0xf93   :  { %v1031_v28 = vsel %vm60_vm0, %v1030_v27, 0.0 }
 0xf94   :  { %1032 = vadd.xlane.f32.xlu1 %v1031_v28 }
 0xfa6   :  { %1132 = vperm.xlu0 %1250, %v1119_v29  }
 0xfad   :  { %1137 = vperm.xlu1 %1251, %v1120_v44  }
 0xfae   :  { %1254 = vset.pattern.permute.xlu0 %v1341_v31 }
 0xfaf   :  { %1173 = vperm.xlu0 %1254, %v1120_v44  }
 0xfb5   :  { %1152 = vperm.xlu1 %1251, %v1123_v24  }
 0xfbd   :  { %1253 = vset.pattern.permute.xlu1 %v1341_v31 }
 0xfbe   :  { %1169 = vperm.xlu1 %1253, %v1119_v29  }
 0xfc6   :  { %1181 = vperm.xlu1 %1253, %v1672_v42  }
0x1005   :  { %v1028_v46 = vpop.xlane.xlu0 %1027 }
0x1006   :  { %v1029_v54 = vmul.f32 %v1028_v46, %v1416_v17 }
0x1007   :  { %v1033_v30 = vpop.xlane.xlu1 %1032 }
0x1008   :  { %v1035_v47 = vmul.f32 %v1029_v54, %v1029_v54  ;;  %v1034_v48 = vmul.f32 %v1033_v30, %v1416_v17  ;;  %v1038_v45 = vsub.f32 %v1025_v37, %v1029_v54 }
0x100a   :  { %v1036_v32 = vsub.f32 %v1034_v48, %v1035_v47 }
0x100c   :  { %v1037_v33 = vmax.f32 %v1036_v32, 0.0 }
0x100e   :  { %v1039_v34 = vadd.f32 1e-05, %v1037_v33 }
0x1010   :  { %1329 = vrsqrt.f32 %v1039_v34  ;;  %vm1046_vm5 = vweird.f32 %v1039_v34 }
0x1016   :  { %v1330_v35 = vpop.eup %1329 }
0x1017   :  { %v1041_v36 = vmul.f32 %v1330_v35, %v1039_v34  ;;  %vm1047_vm6 = vweird.f32 %v1330_v35 }
0x1018   :  { %v1133_v39 = vpop.permute.xlu0 %1132  ;;  %vm1048_vm7 = vmor %vm1046_vm5, %vm1047_vm6 }
0x1019   :  { %v1042_v40 = vmul.f32 %v1330_v35, %v1041_v36  ;;  %v1159_v4 = vmul.f32 %v1692_v16, %v1133_v39 }
0x101b   :  { %v1043_v41 = vmul.f32 0.5, %v1042_v40 }
0x101d   :  { %v1044_v31 = vsub.f32 1.5, %v1043_v41 }
0x101f   :  { %v1045_v43 = vmul.f32 %v1330_v35, %v1044_v31  ;;  %v1138_v42 = vpop.permute.xlu1 %1137 }
0x1020   :  { %v1160_v49 = vmul.f32 %v1692_v16, %v1138_v42 }
0x1021   :  { %v1049_v50 = vsel %vm1048_vm7, %v1330_v35, %v1045_v43  ;;  %v1174_v17 = vpop.permute.xlu0 %1173 }
0x1022   :  { %v1050_v51 = vmul.f32 %v1049_v50, %v1038_v45  ;;  %v1193_v52 = vmul.f32 %v1697_v1, %v1174_v17 }
0x1024   :  { %v1051_v55 = vmul.f32 %v1334_v53, %v1050_v51  ;;  %v1199_v56 = vadd.f32 %v1193_v52, %v1160_v49 }
0x1026   :  { %v1052_v58 = vadd.f32 %v1335_v57, %v1051_v55  ;;  %v1205_v59 = vadd.f32 %v1199_v56, %v1690_v12  ;;  %v1338_v12 = vld [vmem:[%s1796_s8 + $0x8] ss:$0 sm:$0xff] }
0x1027   :  { %v1153_v38 = vpop.permute.xlu1 %1152 }
0x1028   :  { %v1054_v63 = vmul.f32 %v1337_v62, %v1052_v58  ;;  %1212 = vst.msk [vmem:[%s1804_s10 + $0x10] sm:$0xff] %vm1209_vm2, %v1205_v59  ;;  %v1163_v13 = vmul.f32 %v1692_v16, %v1153_v38 }
0x102a   :  { %v1055_v0 = vadd.f32 %v1054_v63, %v1053_v61  ;;  %v1202_v19 = vadd.f32 %v1196_v3, %v1163_v13 }
0x102c   :  { %v1056_v14 = vadd.f32 %v1338_v12, %v1055_v0 }
0x102e   :  { %1058 = vst.msk [vmem:[#allocation2 + $0x28] sm:$0xff] %vm60_vm0, %v1056_v14 }
0x1030   :  { %v1170_v7 = vpop.permute.xlu1 %1169 }
0x1031   :  { %v1192_v9 = vmul.f32 %v1697_v1, %v1170_v7 }
0x1033   :  { %v1198_v11 = vadd.f32 %v1192_v9, %v1159_v4 }
0x1035   :  { %v1204_v6 = vadd.f32 %v1198_v11, %v1103_v25  ;;  %v1064_v15 = vld [vmem:[#allocation2 + $0x28] sm:$0xff] }
0x1036   :  { %1244 = vmatmul.msk.f32.gmra.mxu3 %vm60_vm0, %v1064_v15 }
0x1037   :  { %1211 = vst.msk [vmem:[%s1804_s10 + $0x8] sm:$0xff] %vm1209_vm2, %v1204_v6 }
0x1038   :  { %v1182_v21 = vpop.permute.xlu1 %1181 }
0x1039   :  { %v1195_v2 = vmul.f32 %v1697_v1, %v1182_v21 }
0x103b   :  { %v1201_v23 = vadd.f32 %v1195_v2, %v1162_v18 }
0x103d   :  { %v1207_v8 = vadd.f32 %v1201_v23, %v1112_v5 }
0x103f   :  { %1214 = vst.msk [vmem:[%s1804_s10 + $0x20] sm:$0xff] %vm1209_vm2, %v1207_v8 }
0x10b9   :  { %v1115_v20 = vpop.f32.mrf.mxu3 }
0x10ba   :  { %v1208_v22 = vadd.f32 %v1202_v19, %v1115_v20 }
0x10bc   :  { %1215 = vst.msk [vmem:[%s1804_s10 + $0x28] sm:$0xff] %vm1209_vm2, %v1208_v22 }

</bundles_post_ra>
